<compile_context>
chip_gen: v5e
topology: v5e:2x2
jax: 0.10.0
libtpu: 0.0.40
codegen_flags: <defaults>
</compile_context>

<pallas_src>
import functools

import jax
import jax.numpy as jnp
from jax import lax
from jax.experimental import pallas as pl
from jax.experimental.pallas import tpu as pltpu

# ---- small synthetic Qwen3 config --------------------------------------------
HIDDEN = 128          # config.hidden_size
N_HEADS = 4           # config.num_attention_heads
N_KV_HEADS = 2        # config.num_key_value_heads
HEAD_DIM = 32         # config.head_dim
INTERMEDIATE = 256    # config.intermediate_size
RMS_EPS = 1e-6        # config.rms_norm_eps
ROPE_THETA = 10000.0  # config.rope_theta
GROUP = N_HEADS // N_KV_HEADS            # GQA: q head h reads kv head h // GROUP

Q_W = N_HEADS * HEAD_DIM                 # 128
K_W = N_KV_HEADS * HEAD_DIM              # 64
V_W = N_KV_HEADS * HEAD_DIM              # 64
QK_W = Q_W + K_W                         # 192
QKV_W = Q_W + K_W + V_W                  # 256
FUSED_W = QKV_W + QK_W                   # 448 = [q | k | v | rot(q) | rot(k)]


# ---- fused decoder-layer kernel ------------------------------------------------
def _decoder_layer_kernel(x_ref, ln1_ref, wqkv_ref, avg_ref, nwcos_ref, nwsin_ref,
                          wo_ref, ln2_ref, wgu_ref, wdown_ref, o_ref,
                          *, seq_len, batches):
    f32 = jnp.float32
    x = x_ref[...].astype(f32)                                  # (T, H) residual #1

    # --- input RMSNorm (f32) ----------------------------------------------------
    ln1 = ln1_ref[...].astype(f32)
    xn = x * lax.rsqrt(jnp.mean(x * x, axis=-1, keepdims=True) + RMS_EPS) * ln1

    # --- one fused MXU pass: [q | k | v | rotate_half(q) | rotate_half(k)] -------
    qkv = jnp.dot(xn.astype(wqkv_ref.dtype), wqkv_ref[...],
                  preferred_element_type=f32)                   # (T, FUSED_W) f32

    qk = qkv[:, :QK_W]                                          # (T, 192) raw q|k
    v_bf = qkv[:, QK_W:QKV_W].astype(jnp.bfloat16)              # (T, 64)
    qk_rot = qkv[:, QKV_W:]                                     # (T, 192) rot(q)|rot(k)

    # per-head RMSNorm variance via block-diagonal averaging matmul (lane-dense,
    # no reshapes / lane shuffles); norm weights, cos/sin and the 1/sqrt(D) query
    # scale are pre-folded host-side into nwcos/nwsin.
    hvar = jnp.dot(qk * qk, avg_ref[...], preferred_element_type=f32)   # (T, 192)
    inv_rms = lax.rsqrt(hvar + RMS_EPS)
    qk_roped = (inv_rms * (qk * nwcos_ref[...] + qk_rot * nwsin_ref[...])
                ).astype(jnp.bfloat16)                          # cast once at MXU boundary

    q_bf = qk_roped[:, :Q_W]                                    # (T, 128)
    k_bf = qk_roped[:, Q_W:]                                    # (T, 64)

    # causal mask shared by every batch block / head
    row = lax.broadcasted_iota(jnp.int32, (seq_len, seq_len), 0)
    col = lax.broadcasted_iota(jnp.int32, (seq_len, seq_len), 1)
    causal = row >= col

    wo = wo_ref[...]                                            # (Q_W, H) bf16
    dd = (((1,), (1,)), ((), ()))                               # contract dim 1 of both

    attn_blocks = []
    for b in range(batches):                                    # static, tiny
        rows = slice(b * seq_len, (b + 1) * seq_len)
        qb, kb, vb = q_bf[rows], k_bf[rows], v_bf[rows]
        acc = jnp.zeros((seq_len, HIDDEN), f32)
        for h in range(N_HEADS):
            g = h // GROUP
            qh = qb[:, h * HEAD_DIM:(h + 1) * HEAD_DIM]
            kh = kb[:, g * HEAD_DIM:(g + 1) * HEAD_DIM]
            vh = vb[:, g * HEAD_DIM:(g + 1) * HEAD_DIM]
            s = lax.dot_general(qh, kh, dd, preferred_element_type=f32)  # (S, S), no kh.T
            # f32 masking: keep the -1e30 fill strictly before any bf16 cast.
            s = jnp.where(causal, s, -1e30)
            p = jnp.exp(s - jnp.max(s, axis=-1, keepdims=True))
            p = p * pl.reciprocal(jnp.sum(p, axis=-1, keepdims=True), approx=True)
            ctx = jnp.dot(p.astype(jnp.bfloat16), vh, preferred_element_type=f32)
            # fused o_proj: accumulate directly into the lane-dense (S, H) slab.
            acc = acc + jnp.dot(ctx.astype(jnp.bfloat16),
                                wo[h * HEAD_DIM:(h + 1) * HEAD_DIM, :],
                                preferred_element_type=f32)
        attn_blocks.append(acc)
    attn = attn_blocks[0] if batches == 1 else jnp.concatenate(attn_blocks, axis=0)

    # --- residual + post-attn RMSNorm + fused gate/up + SiLU*up + down + residual
    h1 = x + attn                                               # (T, H) residual #2
    ln2 = ln2_ref[...].astype(f32)
    h1n = h1 * lax.rsqrt(jnp.mean(h1 * h1, axis=-1, keepdims=True) + RMS_EPS) * ln2
    gu = jnp.dot(h1n.astype(wgu_ref.dtype), wgu_ref[...],
                 preferred_element_type=f32)                    # (T, 2*I)
    g = gu[:, :INTERMEDIATE]
    u = gu[:, INTERMEDIATE:]
    act = (g * jax.nn.sigmoid(g)) * u                           # SiluAndMul (f32)
    out = h1 + jnp.dot(act.astype(wdown_ref.dtype), wdown_ref[...],
                       preferred_element_type=f32)
    o_ref[...] = out.astype(o_ref.dtype)


# ---- wrapper --------------------------------------------------------------------
def qwen3_decoder_layer(hidden_states, cos, sin, params, *, num_token_blocks=1):
    """num_token_blocks=1 folds everything into one fat block (best on v5e/v6e's single
    TensorCore); set 2 on v7x so its two TensorCores each get half the batches."""
    B, S, H = hidden_states.shape
    D = HEAD_DIM
    assert B % num_token_blocks == 0
    bpb = B // num_token_blocks                 # batches per grid step
    TB = bpb * S                                # token rows per grid step
    T = B * S

    x2d = hidden_states.reshape(T, H)

    # -- pre-fold per-head norm weights, cos/sin, and the query scale into two
    #    lane-dense (T, QK_W) operands (outside the kernel, tiny one-shot XLA ops).
    cosf = cos.reshape(S, D).astype(jnp.float32)
    sinf = sin.reshape(S, D).astype(jnp.float32)
    qn = params["q_norm"].reshape(1, D).astype(jnp.float32)
    kn = params["k_norm"].reshape(1, D).astype(jnp.float32)
    half = D // 2
    roll_half = lambda w: jnp.concatenate([w[:, half:], w[:, :half]], axis=-1)
    scale = jnp.float32(D ** -0.5)

    nwcos = jnp.concatenate(
        [jnp.tile(cosf * qn * scale, (1, N_HEADS)),
         jnp.tile(cosf * kn, (1, N_KV_HEADS))], axis=-1)                # (S, 192)
    nwsin = jnp.concatenate(
        [jnp.tile(sinf * roll_half(qn) * scale, (1, N_HEADS)),
         jnp.tile(sinf * roll_half(kn), (1, N_KV_HEADS))], axis=-1)     # (S, 192)
    nwcos = jnp.tile(nwcos, (B, 1))             # (T, 192), positions repeat per batch
    nwsin = jnp.tile(nwsin, (B, 1))

    # block-diagonal per-head averaging matrix (RMSNorm variance, one tiny MXU pass)
    idx = jnp.arange(QK_W)
    avg = jnp.equal(idx[:, None] // D, idx[None, :] // D).astype(jnp.float32) / D

    operands = (x2d, params["input_layernorm"], params["wqkv"], avg, nwcos, nwsin,
                params["wo"], params["post_attention_layernorm"],
                params["wgu"], params["wdown"])

    # advisory cost estimate (weights are fetched once; constant index_maps)
    mm_flops = 2 * T * (H * FUSED_W + QK_W * QK_W + H * 2 * INTERMEDIATE + INTERMEDIATE * H)
    attn_flops = B * N_HEADS * (4 * S * S * D + 2 * S * D * H)
    transcendentals = B * N_HEADS * S * S + T * INTERMEDIATE + 4 * T
    bytes_accessed = sum(int(a.nbytes) for a in operands) + T * H * 4
    cost = pl.CostEstimate(flops=int(mm_flops + attn_flops),
                           transcendentals=int(transcendentals),
                           bytes_accessed=int(bytes_accessed))

    bcast = lambda shape: pl.BlockSpec(shape, lambda i, _s=shape: (0,) * len(_s))
    kernel = functools.partial(_decoder_layer_kernel, seq_len=S, batches=bpb)

    out2d = pl.pallas_call(
        kernel,
        out_shape=jax.ShapeDtypeStruct((T, H), hidden_states.dtype),
        grid=(num_token_blocks,),
        in_specs=[
            pl.BlockSpec((TB, H), lambda i: (i, 0)),        # folded hidden states
            bcast((1, H)),                                  # input_layernorm
            bcast((H, FUSED_W)),                            # fused q/k/v + pre-rotated q/k
            bcast((QK_W, QK_W)),                            # per-head averaging matrix
            pl.BlockSpec((TB, QK_W), lambda i: (i, 0)),     # norm_w * cos (q-scaled)
            pl.BlockSpec((TB, QK_W), lambda i: (i, 0)),     # rolled norm_w * sin (q-scaled)
            bcast((Q_W, H)),                                # o_proj weight
            bcast((1, H)),                                  # post_attention_layernorm
            bcast((H, 2 * INTERMEDIATE)),                   # fused gate/up weight
            bcast((INTERMEDIATE, H)),                       # down_proj weight
        ],
        out_specs=pl.BlockSpec((TB, H), lambda i: (i, 0)),
        compiler_params=pltpu.CompilerParams(
            dimension_semantics=("parallel",)),
        cost_estimate=cost,
    )(*operands)
    return out2d.reshape(B, S, H)


# ---- deterministic parameter init ----------------------------------------------
def _rot_cols(w):
    """Columns producing rotate_half() of the projection output (baked at init)."""
    half = HEAD_DIM // 2
    nh = w.shape[1] // HEAD_DIM
    cols = []
    for h in range(nh):
        wh = w[:, h * HEAD_DIM:(h + 1) * HEAD_DIM]
        cols.append(jnp.concatenate([-wh[:, half:], wh[:, :half]], axis=-1))
    return jnp.concatenate(cols, axis=-1)


def init_params(key):
    ks = jax.random.split(key, 7)
    s = 0.02
    wq = s * jax.random.normal(ks[0], (HIDDEN, Q_W), jnp.float32)
    wk = s * jax.random.normal(ks[1], (HIDDEN, K_W), jnp.float32)
    wv = s * jax.random.normal(ks[2], (HIDDEN, V_W), jnp.float32)
    wo = s * jax.random.normal(ks[3], (Q_W, HIDDEN), jnp.float32)
    wg = s * jax.random.normal(ks[4], (HIDDEN, INTERMEDIATE), jnp.float32)
    wu = s * jax.random.normal(ks[5], (HIDDEN, INTERMEDIATE), jnp.float32)
    wd = s * jax.random.normal(ks[6], (INTERMEDIATE, HIDDEN), jnp.float32)
    return {
        "input_layernorm": jnp.ones((1, HIDDEN), jnp.float32),
        "post_attention_layernorm": jnp.ones((1, HIDDEN), jnp.float32),
        "q_norm": jnp.ones((1, HEAD_DIM), jnp.float32),
        "k_norm": jnp.ones((1, HEAD_DIM), jnp.float32),
        # bf16 "linear dtype" weights (module casts activations to the linear dtype);
        # the last QK_W columns are the rotate_half permutation baked into Wq/Wk.
        "wqkv": jnp.concatenate([wq, wk, wv, _rot_cols(wq), _rot_cols(wk)],
                                axis=1).astype(jnp.bfloat16),
        "wo": wo.astype(jnp.bfloat16),
        "wgu": jnp.concatenate([wg, wu], axis=1).astype(jnp.bfloat16),
        "wdown": wd.astype(jnp.bfloat16),
    }


def make_rope(seq_len):
    # cos/sin shaped [seq_len, 1, head_dim] as in the module's forward signature.
    inv_freq = 1.0 / (ROPE_THETA ** (jnp.arange(0, HEAD_DIM, 2, dtype=jnp.float32) / HEAD_DIM))
    pos = jnp.arange(seq_len, dtype=jnp.float32)
    angles = pos[:, None] * inv_freq[None, :]
    emb = jnp.concatenate([angles, angles], axis=-1)
    return jnp.cos(emb)[:, None, :], jnp.sin(emb)[:, None, :]


# ---- pure-JAX reference (mirrors the PyTorch module semantics) -------------------
def _reference(x, cos, sin, params):
    f32 = jnp.float32
    B, S, H = x.shape
    D = HEAD_DIM
    wqkv = params["wqkv"].astype(f32)
    wq, wk, wv = wqkv[:, :Q_W], wqkv[:, Q_W:QK_W], wqkv[:, QK_W:QKV_W]

    def rms(v, w):
        return v * lax.rsqrt(jnp.mean(v * v, axis=-1, keepdims=True) + RMS_EPS) * w

    xn = rms(x.astype(f32), params["input_layernorm"].astype(f32).reshape(H))
    q = jnp.einsum("bsh,hd->bsd", xn, wq).reshape(B, S, N_HEADS, D)
    k = jnp.einsum("bsh,hd->bsd", xn, wk).reshape(B, S, N_KV_HEADS, D)
    v = jnp.einsum("bsh,hd->bsd", xn, wv).reshape(B, S, N_KV_HEADS, D)
    q = rms(q, params["q_norm"].astype(f32).reshape(D))
    k = rms(k, params["k_norm"].astype(f32).reshape(D))
    cos_b = cos.reshape(1, S, 1, D).astype(f32)
    sin_b = sin.reshape(1, S, 1, D).astype(f32)
    rot = lambda t: jnp.concatenate([-t[..., D // 2:], t[..., :D // 2]], axis=-1)
    q = q * cos_b + rot(q) * sin_b
    k = k * cos_b + rot(k) * sin_b
    k = jnp.repeat(k, GROUP, axis=2)
    v = jnp.repeat(v, GROUP, axis=2)
    scores = jnp.einsum("bqhd,bkhd->bhqk", q, k) * (D ** -0.5)
    mask = jnp.tril(jnp.ones((S, S), bool))
    scores = jnp.where(mask, scores, -jnp.inf)
    p = jax.nn.softmax(scores, axis=-1)
    ctx = jnp.einsum("bhqk,bkhd->bqhd", p, v).reshape(B, S, Q_W)
    h1 = x.astype(f32) + jnp.einsum("bsd,dh->bsh", ctx, params["wo"].astype(f32))
    h1n = rms(h1, params["post_attention_layernorm"].astype(f32).reshape(H))
    gu = jnp.einsum("bsh,hi->bsi", h1n, params["wgu"].astype(f32))
    g, u = gu[..., :INTERMEDIATE], gu[..., INTERMEDIATE:]
    out = h1 + jnp.einsum("bsi,ih->bsh", (g * jax.nn.sigmoid(g)) * u,
                          params["wdown"].astype(f32))
    return out


if __name__ == "__main__":
    B, S = 2, 8
    key = jax.random.PRNGKey(0)
    k_params, k_x = jax.random.split(key)
    params = init_params(k_params)
    hidden_states = jax.random.normal(k_x, (B, S, HIDDEN), jnp.float32)
    cos, sin = make_rope(S)

    out = qwen3_decoder_layer(hidden_states, cos, sin, params)
    out = jax.block_until_ready(out)

    assert out.shape == (B, S, HIDDEN) and out.dtype == jnp.float32
    assert bool(jnp.all(jnp.isfinite(out)))

    ref = _reference(hidden_states, cos, sin, params)
    err = float(jnp.max(jnp.abs(out - ref.astype(out.dtype))))
    assert err < 5e-2, f"max abs error vs reference: {err}"
    print("KERNEL_OK")
</pallas_src>

<mosaic_0001>
module attributes {stable_mosaic.version = 11 : i64} {
  func.func @_decoder_layer_kernel(%arg0: i32, %arg1: memref<16x128xf32, #tpu.memory_space<vmem>>, %arg2: memref<1x128xf32, #tpu.memory_space<vmem>>, %arg3: memref<128x448xbf16, #tpu.memory_space<vmem>>, %arg4: memref<192x192xf32, #tpu.memory_space<vmem>>, %arg5: memref<16x192xf32, #tpu.memory_space<vmem>>, %arg6: memref<16x192xf32, #tpu.memory_space<vmem>>, %arg7: memref<128x128xbf16, #tpu.memory_space<vmem>>, %arg8: memref<1x128xf32, #tpu.memory_space<vmem>>, %arg9: memref<128x512xbf16, #tpu.memory_space<vmem>>, %arg10: memref<256x128xbf16, #tpu.memory_space<vmem>>, %arg11: memref<16x128xf32, #tpu.memory_space<vmem>>) attributes {dimension_semantics = [#tpu.dimension_semantics<parallel>], iteration_bounds = array<i64: 1>, scalar_prefetch = 0 : i64, scratch_operands = 0 : i64, tpu.core_type = #tpu.core_type<tc>, window_params = [{transform_indices = @transform_0, window_bounds = array<i64: 16, 128>}, {pipeline_mode = #tpu.pipeline_mode<synchronous>, transform_indices = @transform_1, window_bounds = array<i64: 1, 128>}, {pipeline_mode = #tpu.pipeline_mode<synchronous>, transform_indices = @transform_2, window_bounds = array<i64: 128, 448>}, {pipeline_mode = #tpu.pipeline_mode<synchronous>, transform_indices = @transform_3, window_bounds = array<i64: 192, 192>}, {transform_indices = @transform_4, window_bounds = array<i64: 16, 192>}, {transform_indices = @transform_5, window_bounds = array<i64: 16, 192>}, {pipeline_mode = #tpu.pipeline_mode<synchronous>, transform_indices = @transform_6, window_bounds = array<i64: 128, 128>}, {pipeline_mode = #tpu.pipeline_mode<synchronous>, transform_indices = @transform_7, window_bounds = array<i64: 1, 128>}, {pipeline_mode = #tpu.pipeline_mode<synchronous>, transform_indices = @transform_8, window_bounds = array<i64: 128, 512>}, {pipeline_mode = #tpu.pipeline_mode<synchronous>, transform_indices = @transform_9, window_bounds = array<i64: 256, 128>}, {transform_indices = @transform_10, window_bounds = array<i64: 16, 128>}]} {
    %c0 = arith.constant 0 : index
    %c0_0 = arith.constant 0 : index
    %0 = vector.load %arg1[%c0, %c0_0] : memref<16x128xf32, #tpu.memory_space<vmem>>, vector<16x128xf32>
    %c0_1 = arith.constant 0 : index
    %c0_2 = arith.constant 0 : index
    %1 = vector.load %arg2[%c0_1, %c0_2] : memref<1x128xf32, #tpu.memory_space<vmem>>, vector<1x128xf32>
    %2 = arith.mulf %0, %0 : vector<16x128xf32>
    %cst = arith.constant dense<0.000000e+00> : vector<16xf32>
    %3 = vector.multi_reduction <add>, %2, %cst [1] : vector<16x128xf32> to vector<16xf32>
    %4 = vector.shape_cast %3 : vector<16xf32> to vector<16x1xf32>
    %cst_3 = arith.constant 1.280000e+02 : f32
    %5 = vector.broadcast %cst_3 : f32 to vector<16x1xf32>
    %6 = arith.divf %4, %5 : vector<16x1xf32>
    %cst_4 = arith.constant 9.99999997E-7 : f32
    %7 = vector.broadcast %cst_4 : f32 to vector<16x1xf32>
    %8 = arith.addf %6, %7 : vector<16x1xf32>
    %9 = math.rsqrt %8 : vector<16x1xf32>
    %10 = vector.broadcast %9 : vector<16x1xf32> to vector<16x128xf32>
    %11 = arith.mulf %0, %10 : vector<16x128xf32>
    %12 = vector.broadcast %1 : vector<1x128xf32> to vector<16x128xf32>
    %13 = arith.mulf %11, %12 : vector<16x128xf32>
    %14 = arith.truncf %13 : vector<16x128xf32> to vector<16x128xbf16>
    %c0_5 = arith.constant 0 : index
    %c0_6 = arith.constant 0 : index
    %15 = vector.load %arg3[%c0_5, %c0_6] : memref<128x448xbf16, #tpu.memory_space<vmem>>, vector<128x448xbf16>
    %cst_7 = arith.constant dense<0.000000e+00> : vector<16x448xf32>
    %16 = tpu.matmul %14, %15, %cst_7 {dimension_numbers = #tpu.dot_dimension_numbers<[1], [0], [0], [1], [0, 0, 1, 1], [], []>} : vector<16x128xbf16>, vector<128x448xbf16>, vector<16x448xf32> -> vector<16x448xf32>
    %17 = vector.extract_strided_slice %16 {offsets = [0, 0], sizes = [16, 192], strides = [1, 1]} : vector<16x448xf32> to vector<16x192xf32>
    %18 = vector.extract_strided_slice %16 {offsets = [0, 192], sizes = [16, 64], strides = [1, 1]} : vector<16x448xf32> to vector<16x64xf32>
    %19 = arith.truncf %18 : vector<16x64xf32> to vector<16x64xbf16>
    %20 = vector.extract_strided_slice %16 {offsets = [0, 256], sizes = [16, 192], strides = [1, 1]} : vector<16x448xf32> to vector<16x192xf32>
    %21 = arith.mulf %17, %17 : vector<16x192xf32>
    %c0_8 = arith.constant 0 : index
    %c0_9 = arith.constant 0 : index
    %22 = vector.load %arg4[%c0_8, %c0_9] : memref<192x192xf32, #tpu.memory_space<vmem>>, vector<192x192xf32>
    %cst_10 = arith.constant dense<0.000000e+00> : vector<16x192xf32>
    %23 = tpu.matmul %21, %22, %cst_10 {dimension_numbers = #tpu.dot_dimension_numbers<[1], [0], [0], [1], [0, 0, 1, 1], [], []>} : vector<16x192xf32>, vector<192x192xf32>, vector<16x192xf32> -> vector<16x192xf32>
    %cst_11 = arith.constant 9.99999997E-7 : f32
    %24 = vector.broadcast %cst_11 : f32 to vector<16x192xf32>
    %25 = arith.addf %23, %24 : vector<16x192xf32>
    %26 = math.rsqrt %25 : vector<16x192xf32>
    %c0_12 = arith.constant 0 : index
    %c0_13 = arith.constant 0 : index
    %27 = vector.load %arg5[%c0_12, %c0_13] : memref<16x192xf32, #tpu.memory_space<vmem>>, vector<16x192xf32>
    %28 = arith.mulf %17, %27 : vector<16x192xf32>
    %c0_14 = arith.constant 0 : index
    %c0_15 = arith.constant 0 : index
    %29 = vector.load %arg6[%c0_14, %c0_15] : memref<16x192xf32, #tpu.memory_space<vmem>>, vector<16x192xf32>
    %30 = arith.mulf %20, %29 : vector<16x192xf32>
    %31 = arith.addf %28, %30 : vector<16x192xf32>
    %32 = arith.mulf %26, %31 : vector<16x192xf32>
    %33 = arith.truncf %32 : vector<16x192xf32> to vector<16x192xbf16>
    %34 = vector.extract_strided_slice %33 {offsets = [0, 0], sizes = [16, 128], strides = [1, 1]} : vector<16x192xbf16> to vector<16x128xbf16>
    %35 = vector.extract_strided_slice %33 {offsets = [0, 128], sizes = [16, 64], strides = [1, 1]} : vector<16x192xbf16> to vector<16x64xbf16>
    %36 = tpu.iota {dimensions = array<i32: 0>} : vector<8x8xi32>
    %37 = tpu.iota {dimensions = array<i32: 1>} : vector<8x8xi32>
    %38 = arith.cmpi sge, %36, %37 : vector<8x8xi32>
    %c0_16 = arith.constant 0 : index
    %c0_17 = arith.constant 0 : index
    %39 = vector.load %arg7[%c0_16, %c0_17] : memref<128x128xbf16, #tpu.memory_space<vmem>>, vector<128x128xbf16>
    %40 = vector.extract_strided_slice %34 {offsets = [0, 0], sizes = [8, 128], strides = [1, 1]} : vector<16x128xbf16> to vector<8x128xbf16>
    %41 = vector.extract_strided_slice %35 {offsets = [0, 0], sizes = [8, 64], strides = [1, 1]} : vector<16x64xbf16> to vector<8x64xbf16>
    %42 = vector.extract_strided_slice %19 {offsets = [0, 0], sizes = [8, 64], strides = [1, 1]} : vector<16x64xbf16> to vector<8x64xbf16>
    %cst_18 = arith.constant 0.000000e+00 : f32
    %43 = vector.broadcast %cst_18 : f32 to vector<8x128xf32>
    %44 = vector.extract_strided_slice %40 {offsets = [0, 0], sizes = [8, 32], strides = [1, 1]} : vector<8x128xbf16> to vector<8x32xbf16>
    %45 = vector.extract_strided_slice %41 {offsets = [0, 0], sizes = [8, 32], strides = [1, 1]} : vector<8x64xbf16> to vector<8x32xbf16>
    %46 = vector.extract_strided_slice %42 {offsets = [0, 0], sizes = [8, 32], strides = [1, 1]} : vector<8x64xbf16> to vector<8x32xbf16>
    %cst_19 = arith.constant dense<0.000000e+00> : vector<8x8xf32>
    %47 = tpu.matmul %44, %45, %cst_19 {dimension_numbers = #tpu.dot_dimension_numbers<[1], [1], [0], [0], [0, 0, 1, 0], [], []>} : vector<8x32xbf16>, vector<8x32xbf16>, vector<8x8xf32> -> vector<8x8xf32>
    %cst_20 = arith.constant -1.000000e+30 : f32
    %48 = vector.broadcast %cst_20 : f32 to vector<8x8xf32>
    %49 = arith.select %38, %47, %48 : vector<8x8xi1>, vector<8x8xf32>
    %cst_21 = arith.constant dense<0xFF800000> : vector<8xf32>
    %50 = vector.multi_reduction <maximumf>, %49, %cst_21 [1] : vector<8x8xf32> to vector<8xf32>
    %51 = vector.shape_cast %50 : vector<8xf32> to vector<8x1xf32>
    %52 = vector.broadcast %51 : vector<8x1xf32> to vector<8x8xf32>
    %53 = arith.subf %49, %52 : vector<8x8xf32>
    %54 = math.exp %53 : vector<8x8xf32>
    %cst_22 = arith.constant dense<0.000000e+00> : vector<8xf32>
    %55 = vector.multi_reduction <add>, %54, %cst_22 [1] : vector<8x8xf32> to vector<8xf32>
    %56 = vector.shape_cast %55 : vector<8xf32> to vector<8x1xf32>
    %57 = tpu.reciprocal %56 {approx = true} : vector<8x1xf32> -> vector<8x1xf32>
    %58 = vector.broadcast %57 : vector<8x1xf32> to vector<8x8xf32>
    %59 = arith.mulf %54, %58 : vector<8x8xf32>
    %60 = arith.truncf %59 : vector<8x8xf32> to vector<8x8xbf16>
    %cst_23 = arith.constant dense<0.000000e+00> : vector<8x32xf32>
    %61 = tpu.matmul %60, %46, %cst_23 {dimension_numbers = #tpu.dot_dimension_numbers<[1], [0], [0], [1], [0, 0, 1, 1], [], []>} : vector<8x8xbf16>, vector<8x32xbf16>, vector<8x32xf32> -> vector<8x32xf32>
    %62 = arith.truncf %61 : vector<8x32xf32> to vector<8x32xbf16>
    %63 = vector.extract_strided_slice %39 {offsets = [0, 0], sizes = [32, 128], strides = [1, 1]} : vector<128x128xbf16> to vector<32x128xbf16>
    %cst_24 = arith.constant dense<0.000000e+00> : vector<8x128xf32>
    %64 = tpu.matmul %62, %63, %cst_24 {dimension_numbers = #tpu.dot_dimension_numbers<[1], [0], [0], [1], [0, 0, 1, 1], [], []>} : vector<8x32xbf16>, vector<32x128xbf16>, vector<8x128xf32> -> vector<8x128xf32>
    %65 = arith.addf %43, %64 : vector<8x128xf32>
    %66 = vector.extract_strided_slice %40 {offsets = [0, 32], sizes = [8, 32], strides = [1, 1]} : vector<8x128xbf16> to vector<8x32xbf16>
    %67 = vector.extract_strided_slice %41 {offsets = [0, 0], sizes = [8, 32], strides = [1, 1]} : vector<8x64xbf16> to vector<8x32xbf16>
    %68 = vector.extract_strided_slice %42 {offsets = [0, 0], sizes = [8, 32], strides = [1, 1]} : vector<8x64xbf16> to vector<8x32xbf16>
    %cst_25 = arith.constant dense<0.000000e+00> : vector<8x8xf32>
    %69 = tpu.matmul %66, %67, %cst_25 {dimension_numbers = #tpu.dot_dimension_numbers<[1], [1], [0], [0], [0, 0, 1, 0], [], []>} : vector<8x32xbf16>, vector<8x32xbf16>, vector<8x8xf32> -> vector<8x8xf32>
    %cst_26 = arith.constant -1.000000e+30 : f32
    %70 = vector.broadcast %cst_26 : f32 to vector<8x8xf32>
    %71 = arith.select %38, %69, %70 : vector<8x8xi1>, vector<8x8xf32>
    %cst_27 = arith.constant dense<0xFF800000> : vector<8xf32>
    %72 = vector.multi_reduction <maximumf>, %71, %cst_27 [1] : vector<8x8xf32> to vector<8xf32>
    %73 = vector.shape_cast %72 : vector<8xf32> to vector<8x1xf32>
    %74 = vector.broadcast %73 : vector<8x1xf32> to vector<8x8xf32>
    %75 = arith.subf %71, %74 : vector<8x8xf32>
    %76 = math.exp %75 : vector<8x8xf32>
    %cst_28 = arith.constant dense<0.000000e+00> : vector<8xf32>
    %77 = vector.multi_reduction <add>, %76, %cst_28 [1] : vector<8x8xf32> to vector<8xf32>
    %78 = vector.shape_cast %77 : vector<8xf32> to vector<8x1xf32>
    %79 = tpu.reciprocal %78 {approx = true} : vector<8x1xf32> -> vector<8x1xf32>
    %80 = vector.broadcast %79 : vector<8x1xf32> to vector<8x8xf32>
    %81 = arith.mulf %76, %80 : vector<8x8xf32>
    %82 = arith.truncf %81 : vector<8x8xf32> to vector<8x8xbf16>
    %cst_29 = arith.constant dense<0.000000e+00> : vector<8x32xf32>
    %83 = tpu.matmul %82, %68, %cst_29 {dimension_numbers = #tpu.dot_dimension_numbers<[1], [0], [0], [1], [0, 0, 1, 1], [], []>} : vector<8x8xbf16>, vector<8x32xbf16>, vector<8x32xf32> -> vector<8x32xf32>
    %84 = arith.truncf %83 : vector<8x32xf32> to vector<8x32xbf16>
    %85 = vector.extract_strided_slice %39 {offsets = [32, 0], sizes = [32, 128], strides = [1, 1]} : vector<128x128xbf16> to vector<32x128xbf16>
    %cst_30 = arith.constant dense<0.000000e+00> : vector<8x128xf32>
    %86 = tpu.matmul %84, %85, %cst_30 {dimension_numbers = #tpu.dot_dimension_numbers<[1], [0], [0], [1], [0, 0, 1, 1], [], []>} : vector<8x32xbf16>, vector<32x128xbf16>, vector<8x128xf32> -> vector<8x128xf32>
    %87 = arith.addf %65, %86 : vector<8x128xf32>
    %88 = vector.extract_strided_slice %40 {offsets = [0, 64], sizes = [8, 32], strides = [1, 1]} : vector<8x128xbf16> to vector<8x32xbf16>
    %89 = vector.extract_strided_slice %41 {offsets = [0, 32], sizes = [8, 32], strides = [1, 1]} : vector<8x64xbf16> to vector<8x32xbf16>
    %90 = vector.extract_strided_slice %42 {offsets = [0, 32], sizes = [8, 32], strides = [1, 1]} : vector<8x64xbf16> to vector<8x32xbf16>
    %cst_31 = arith.constant dense<0.000000e+00> : vector<8x8xf32>
    %91 = tpu.matmul %88, %89, %cst_31 {dimension_numbers = #tpu.dot_dimension_numbers<[1], [1], [0], [0], [0, 0, 1, 0], [], []>} : vector<8x32xbf16>, vector<8x32xbf16>, vector<8x8xf32> -> vector<8x8xf32>
    %cst_32 = arith.constant -1.000000e+30 : f32
    %92 = vector.broadcast %cst_32 : f32 to vector<8x8xf32>
    %93 = arith.select %38, %91, %92 : vector<8x8xi1>, vector<8x8xf32>
    %cst_33 = arith.constant dense<0xFF800000> : vector<8xf32>
    %94 = vector.multi_reduction <maximumf>, %93, %cst_33 [1] : vector<8x8xf32> to vector<8xf32>
    %95 = vector.shape_cast %94 : vector<8xf32> to vector<8x1xf32>
    %96 = vector.broadcast %95 : vector<8x1xf32> to vector<8x8xf32>
    %97 = arith.subf %93, %96 : vector<8x8xf32>
    %98 = math.exp %97 : vector<8x8xf32>
    %cst_34 = arith.constant dense<0.000000e+00> : vector<8xf32>
    %99 = vector.multi_reduction <add>, %98, %cst_34 [1] : vector<8x8xf32> to vector<8xf32>
    %100 = vector.shape_cast %99 : vector<8xf32> to vector<8x1xf32>
    %101 = tpu.reciprocal %100 {approx = true} : vector<8x1xf32> -> vector<8x1xf32>
    %102 = vector.broadcast %101 : vector<8x1xf32> to vector<8x8xf32>
    %103 = arith.mulf %98, %102 : vector<8x8xf32>
    %104 = arith.truncf %103 : vector<8x8xf32> to vector<8x8xbf16>
    %cst_35 = arith.constant dense<0.000000e+00> : vector<8x32xf32>
    %105 = tpu.matmul %104, %90, %cst_35 {dimension_numbers = #tpu.dot_dimension_numbers<[1], [0], [0], [1], [0, 0, 1, 1], [], []>} : vector<8x8xbf16>, vector<8x32xbf16>, vector<8x32xf32> -> vector<8x32xf32>
    %106 = arith.truncf %105 : vector<8x32xf32> to vector<8x32xbf16>
    %107 = vector.extract_strided_slice %39 {offsets = [64, 0], sizes = [32, 128], strides = [1, 1]} : vector<128x128xbf16> to vector<32x128xbf16>
    %cst_36 = arith.constant dense<0.000000e+00> : vector<8x128xf32>
    %108 = tpu.matmul %106, %107, %cst_36 {dimension_numbers = #tpu.dot_dimension_numbers<[1], [0], [0], [1], [0, 0, 1, 1], [], []>} : vector<8x32xbf16>, vector<32x128xbf16>, vector<8x128xf32> -> vector<8x128xf32>
    %109 = arith.addf %87, %108 : vector<8x128xf32>
    %110 = vector.extract_strided_slice %40 {offsets = [0, 96], sizes = [8, 32], strides = [1, 1]} : vector<8x128xbf16> to vector<8x32xbf16>
    %111 = vector.extract_strided_slice %41 {offsets = [0, 32], sizes = [8, 32], strides = [1, 1]} : vector<8x64xbf16> to vector<8x32xbf16>
    %112 = vector.extract_strided_slice %42 {offsets = [0, 32], sizes = [8, 32], strides = [1, 1]} : vector<8x64xbf16> to vector<8x32xbf16>
    %cst_37 = arith.constant dense<0.000000e+00> : vector<8x8xf32>
    %113 = tpu.matmul %110, %111, %cst_37 {dimension_numbers = #tpu.dot_dimension_numbers<[1], [1], [0], [0], [0, 0, 1, 0], [], []>} : vector<8x32xbf16>, vector<8x32xbf16>, vector<8x8xf32> -> vector<8x8xf32>
    %cst_38 = arith.constant -1.000000e+30 : f32
    %114 = vector.broadcast %cst_38 : f32 to vector<8x8xf32>
    %115 = arith.select %38, %113, %114 : vector<8x8xi1>, vector<8x8xf32>
    %cst_39 = arith.constant dense<0xFF800000> : vector<8xf32>
    %116 = vector.multi_reduction <maximumf>, %115, %cst_39 [1] : vector<8x8xf32> to vector<8xf32>
    %117 = vector.shape_cast %116 : vector<8xf32> to vector<8x1xf32>
    %118 = vector.broadcast %117 : vector<8x1xf32> to vector<8x8xf32>
    %119 = arith.subf %115, %118 : vector<8x8xf32>
    %120 = math.exp %119 : vector<8x8xf32>
    %cst_40 = arith.constant dense<0.000000e+00> : vector<8xf32>
    %121 = vector.multi_reduction <add>, %120, %cst_40 [1] : vector<8x8xf32> to vector<8xf32>
    %122 = vector.shape_cast %121 : vector<8xf32> to vector<8x1xf32>
    %123 = tpu.reciprocal %122 {approx = true} : vector<8x1xf32> -> vector<8x1xf32>
    %124 = vector.broadcast %123 : vector<8x1xf32> to vector<8x8xf32>
    %125 = arith.mulf %120, %124 : vector<8x8xf32>
    %126 = arith.truncf %125 : vector<8x8xf32> to vector<8x8xbf16>
    %cst_41 = arith.constant dense<0.000000e+00> : vector<8x32xf32>
    %127 = tpu.matmul %126, %112, %cst_41 {dimension_numbers = #tpu.dot_dimension_numbers<[1], [0], [0], [1], [0, 0, 1, 1], [], []>} : vector<8x8xbf16>, vector<8x32xbf16>, vector<8x32xf32> -> vector<8x32xf32>
    %128 = arith.truncf %127 : vector<8x32xf32> to vector<8x32xbf16>
    %129 = vector.extract_strided_slice %39 {offsets = [96, 0], sizes = [32, 128], strides = [1, 1]} : vector<128x128xbf16> to vector<32x128xbf16>
    %cst_42 = arith.constant dense<0.000000e+00> : vector<8x128xf32>
    %130 = tpu.matmul %128, %129, %cst_42 {dimension_numbers = #tpu.dot_dimension_numbers<[1], [0], [0], [1], [0, 0, 1, 1], [], []>} : vector<8x32xbf16>, vector<32x128xbf16>, vector<8x128xf32> -> vector<8x128xf32>
    %131 = arith.addf %109, %130 : vector<8x128xf32>
    %132 = vector.extract_strided_slice %34 {offsets = [8, 0], sizes = [8, 128], strides = [1, 1]} : vector<16x128xbf16> to vector<8x128xbf16>
    %133 = vector.extract_strided_slice %35 {offsets = [8, 0], sizes = [8, 64], strides = [1, 1]} : vector<16x64xbf16> to vector<8x64xbf16>
    %134 = vector.extract_strided_slice %19 {offsets = [8, 0], sizes = [8, 64], strides = [1, 1]} : vector<16x64xbf16> to vector<8x64xbf16>
    %cst_43 = arith.constant 0.000000e+00 : f32
    %135 = vector.broadcast %cst_43 : f32 to vector<8x128xf32>
    %136 = vector.extract_strided_slice %132 {offsets = [0, 0], sizes = [8, 32], strides = [1, 1]} : vector<8x128xbf16> to vector<8x32xbf16>
    %137 = vector.extract_strided_slice %133 {offsets = [0, 0], sizes = [8, 32], strides = [1, 1]} : vector<8x64xbf16> to vector<8x32xbf16>
    %138 = vector.extract_strided_slice %134 {offsets = [0, 0], sizes = [8, 32], strides = [1, 1]} : vector<8x64xbf16> to vector<8x32xbf16>
    %cst_44 = arith.constant dense<0.000000e+00> : vector<8x8xf32>
    %139 = tpu.matmul %136, %137, %cst_44 {dimension_numbers = #tpu.dot_dimension_numbers<[1], [1], [0], [0], [0, 0, 1, 0], [], []>} : vector<8x32xbf16>, vector<8x32xbf16>, vector<8x8xf32> -> vector<8x8xf32>
    %cst_45 = arith.constant -1.000000e+30 : f32
    %140 = vector.broadcast %cst_45 : f32 to vector<8x8xf32>
    %141 = arith.select %38, %139, %140 : vector<8x8xi1>, vector<8x8xf32>
    %cst_46 = arith.constant dense<0xFF800000> : vector<8xf32>
    %142 = vector.multi_reduction <maximumf>, %141, %cst_46 [1] : vector<8x8xf32> to vector<8xf32>
    %143 = vector.shape_cast %142 : vector<8xf32> to vector<8x1xf32>
    %144 = vector.broadcast %143 : vector<8x1xf32> to vector<8x8xf32>
    %145 = arith.subf %141, %144 : vector<8x8xf32>
    %146 = math.exp %145 : vector<8x8xf32>
    %cst_47 = arith.constant dense<0.000000e+00> : vector<8xf32>
    %147 = vector.multi_reduction <add>, %146, %cst_47 [1] : vector<8x8xf32> to vector<8xf32>
    %148 = vector.shape_cast %147 : vector<8xf32> to vector<8x1xf32>
    %149 = tpu.reciprocal %148 {approx = true} : vector<8x1xf32> -> vector<8x1xf32>
    %150 = vector.broadcast %149 : vector<8x1xf32> to vector<8x8xf32>
    %151 = arith.mulf %146, %150 : vector<8x8xf32>
    %152 = arith.truncf %151 : vector<8x8xf32> to vector<8x8xbf16>
    %cst_48 = arith.constant dense<0.000000e+00> : vector<8x32xf32>
    %153 = tpu.matmul %152, %138, %cst_48 {dimension_numbers = #tpu.dot_dimension_numbers<[1], [0], [0], [1], [0, 0, 1, 1], [], []>} : vector<8x8xbf16>, vector<8x32xbf16>, vector<8x32xf32> -> vector<8x32xf32>
    %154 = arith.truncf %153 : vector<8x32xf32> to vector<8x32xbf16>
    %155 = vector.extract_strided_slice %39 {offsets = [0, 0], sizes = [32, 128], strides = [1, 1]} : vector<128x128xbf16> to vector<32x128xbf16>
    %cst_49 = arith.constant dense<0.000000e+00> : vector<8x128xf32>
    %156 = tpu.matmul %154, %155, %cst_49 {dimension_numbers = #tpu.dot_dimension_numbers<[1], [0], [0], [1], [0, 0, 1, 1], [], []>} : vector<8x32xbf16>, vector<32x128xbf16>, vector<8x128xf32> -> vector<8x128xf32>
    %157 = arith.addf %135, %156 : vector<8x128xf32>
    %158 = vector.extract_strided_slice %132 {offsets = [0, 32], sizes = [8, 32], strides = [1, 1]} : vector<8x128xbf16> to vector<8x32xbf16>
    %159 = vector.extract_strided_slice %133 {offsets = [0, 0], sizes = [8, 32], strides = [1, 1]} : vector<8x64xbf16> to vector<8x32xbf16>
    %160 = vector.extract_strided_slice %134 {offsets = [0, 0], sizes = [8, 32], strides = [1, 1]} : vector<8x64xbf16> to vector<8x32xbf16>
    %cst_50 = arith.constant dense<0.000000e+00> : vector<8x8xf32>
    %161 = tpu.matmul %158, %159, %cst_50 {dimension_numbers = #tpu.dot_dimension_numbers<[1], [1], [0], [0], [0, 0, 1, 0], [], []>} : vector<8x32xbf16>, vector<8x32xbf16>, vector<8x8xf32> -> vector<8x8xf32>
    %cst_51 = arith.constant -1.000000e+30 : f32
    %162 = vector.broadcast %cst_51 : f32 to vector<8x8xf32>
    %163 = arith.select %38, %161, %162 : vector<8x8xi1>, vector<8x8xf32>
    %cst_52 = arith.constant dense<0xFF800000> : vector<8xf32>
    %164 = vector.multi_reduction <maximumf>, %163, %cst_52 [1] : vector<8x8xf32> to vector<8xf32>
    %165 = vector.shape_cast %164 : vector<8xf32> to vector<8x1xf32>
    %166 = vector.broadcast %165 : vector<8x1xf32> to vector<8x8xf32>
    %167 = arith.subf %163, %166 : vector<8x8xf32>
    %168 = math.exp %167 : vector<8x8xf32>
    %cst_53 = arith.constant dense<0.000000e+00> : vector<8xf32>
    %169 = vector.multi_reduction <add>, %168, %cst_53 [1] : vector<8x8xf32> to vector<8xf32>
    %170 = vector.shape_cast %169 : vector<8xf32> to vector<8x1xf32>
    %171 = tpu.reciprocal %170 {approx = true} : vector<8x1xf32> -> vector<8x1xf32>
    %172 = vector.broadcast %171 : vector<8x1xf32> to vector<8x8xf32>
    %173 = arith.mulf %168, %172 : vector<8x8xf32>
    %174 = arith.truncf %173 : vector<8x8xf32> to vector<8x8xbf16>
    %cst_54 = arith.constant dense<0.000000e+00> : vector<8x32xf32>
    %175 = tpu.matmul %174, %160, %cst_54 {dimension_numbers = #tpu.dot_dimension_numbers<[1], [0], [0], [1], [0, 0, 1, 1], [], []>} : vector<8x8xbf16>, vector<8x32xbf16>, vector<8x32xf32> -> vector<8x32xf32>
    %176 = arith.truncf %175 : vector<8x32xf32> to vector<8x32xbf16>
    %177 = vector.extract_strided_slice %39 {offsets = [32, 0], sizes = [32, 128], strides = [1, 1]} : vector<128x128xbf16> to vector<32x128xbf16>
    %cst_55 = arith.constant dense<0.000000e+00> : vector<8x128xf32>
    %178 = tpu.matmul %176, %177, %cst_55 {dimension_numbers = #tpu.dot_dimension_numbers<[1], [0], [0], [1], [0, 0, 1, 1], [], []>} : vector<8x32xbf16>, vector<32x128xbf16>, vector<8x128xf32> -> vector<8x128xf32>
    %179 = arith.addf %157, %178 : vector<8x128xf32>
    %180 = vector.extract_strided_slice %132 {offsets = [0, 64], sizes = [8, 32], strides = [1, 1]} : vector<8x128xbf16> to vector<8x32xbf16>
    %181 = vector.extract_strided_slice %133 {offsets = [0, 32], sizes = [8, 32], strides = [1, 1]} : vector<8x64xbf16> to vector<8x32xbf16>
    %182 = vector.extract_strided_slice %134 {offsets = [0, 32], sizes = [8, 32], strides = [1, 1]} : vector<8x64xbf16> to vector<8x32xbf16>
    %cst_56 = arith.constant dense<0.000000e+00> : vector<8x8xf32>
    %183 = tpu.matmul %180, %181, %cst_56 {dimension_numbers = #tpu.dot_dimension_numbers<[1], [1], [0], [0], [0, 0, 1, 0], [], []>} : vector<8x32xbf16>, vector<8x32xbf16>, vector<8x8xf32> -> vector<8x8xf32>
    %cst_57 = arith.constant -1.000000e+30 : f32
    %184 = vector.broadcast %cst_57 : f32 to vector<8x8xf32>
    %185 = arith.select %38, %183, %184 : vector<8x8xi1>, vector<8x8xf32>
    %cst_58 = arith.constant dense<0xFF800000> : vector<8xf32>
    %186 = vector.multi_reduction <maximumf>, %185, %cst_58 [1] : vector<8x8xf32> to vector<8xf32>
    %187 = vector.shape_cast %186 : vector<8xf32> to vector<8x1xf32>
    %188 = vector.broadcast %187 : vector<8x1xf32> to vector<8x8xf32>
    %189 = arith.subf %185, %188 : vector<8x8xf32>
    %190 = math.exp %189 : vector<8x8xf32>
    %cst_59 = arith.constant dense<0.000000e+00> : vector<8xf32>
    %191 = vector.multi_reduction <add>, %190, %cst_59 [1] : vector<8x8xf32> to vector<8xf32>
    %192 = vector.shape_cast %191 : vector<8xf32> to vector<8x1xf32>
    %193 = tpu.reciprocal %192 {approx = true} : vector<8x1xf32> -> vector<8x1xf32>
    %194 = vector.broadcast %193 : vector<8x1xf32> to vector<8x8xf32>
    %195 = arith.mulf %190, %194 : vector<8x8xf32>
    %196 = arith.truncf %195 : vector<8x8xf32> to vector<8x8xbf16>
    %cst_60 = arith.constant dense<0.000000e+00> : vector<8x32xf32>
    %197 = tpu.matmul %196, %182, %cst_60 {dimension_numbers = #tpu.dot_dimension_numbers<[1], [0], [0], [1], [0, 0, 1, 1], [], []>} : vector<8x8xbf16>, vector<8x32xbf16>, vector<8x32xf32> -> vector<8x32xf32>
    %198 = arith.truncf %197 : vector<8x32xf32> to vector<8x32xbf16>
    %199 = vector.extract_strided_slice %39 {offsets = [64, 0], sizes = [32, 128], strides = [1, 1]} : vector<128x128xbf16> to vector<32x128xbf16>
    %cst_61 = arith.constant dense<0.000000e+00> : vector<8x128xf32>
    %200 = tpu.matmul %198, %199, %cst_61 {dimension_numbers = #tpu.dot_dimension_numbers<[1], [0], [0], [1], [0, 0, 1, 1], [], []>} : vector<8x32xbf16>, vector<32x128xbf16>, vector<8x128xf32> -> vector<8x128xf32>
    %201 = arith.addf %179, %200 : vector<8x128xf32>
    %202 = vector.extract_strided_slice %132 {offsets = [0, 96], sizes = [8, 32], strides = [1, 1]} : vector<8x128xbf16> to vector<8x32xbf16>
    %203 = vector.extract_strided_slice %133 {offsets = [0, 32], sizes = [8, 32], strides = [1, 1]} : vector<8x64xbf16> to vector<8x32xbf16>
    %204 = vector.extract_strided_slice %134 {offsets = [0, 32], sizes = [8, 32], strides = [1, 1]} : vector<8x64xbf16> to vector<8x32xbf16>
    %cst_62 = arith.constant dense<0.000000e+00> : vector<8x8xf32>
    %205 = tpu.matmul %202, %203, %cst_62 {dimension_numbers = #tpu.dot_dimension_numbers<[1], [1], [0], [0], [0, 0, 1, 0], [], []>} : vector<8x32xbf16>, vector<8x32xbf16>, vector<8x8xf32> -> vector<8x8xf32>
    %cst_63 = arith.constant -1.000000e+30 : f32
    %206 = vector.broadcast %cst_63 : f32 to vector<8x8xf32>
    %207 = arith.select %38, %205, %206 : vector<8x8xi1>, vector<8x8xf32>
    %cst_64 = arith.constant dense<0xFF800000> : vector<8xf32>
    %208 = vector.multi_reduction <maximumf>, %207, %cst_64 [1] : vector<8x8xf32> to vector<8xf32>
    %209 = vector.shape_cast %208 : vector<8xf32> to vector<8x1xf32>
    %210 = vector.broadcast %209 : vector<8x1xf32> to vector<8x8xf32>
    %211 = arith.subf %207, %210 : vector<8x8xf32>
    %212 = math.exp %211 : vector<8x8xf32>
    %cst_65 = arith.constant dense<0.000000e+00> : vector<8xf32>
    %213 = vector.multi_reduction <add>, %212, %cst_65 [1] : vector<8x8xf32> to vector<8xf32>
    %214 = vector.shape_cast %213 : vector<8xf32> to vector<8x1xf32>
    %215 = tpu.reciprocal %214 {approx = true} : vector<8x1xf32> -> vector<8x1xf32>
    %216 = vector.broadcast %215 : vector<8x1xf32> to vector<8x8xf32>
    %217 = arith.mulf %212, %216 : vector<8x8xf32>
    %218 = arith.truncf %217 : vector<8x8xf32> to vector<8x8xbf16>
    %cst_66 = arith.constant dense<0.000000e+00> : vector<8x32xf32>
    %219 = tpu.matmul %218, %204, %cst_66 {dimension_numbers = #tpu.dot_dimension_numbers<[1], [0], [0], [1], [0, 0, 1, 1], [], []>} : vector<8x8xbf16>, vector<8x32xbf16>, vector<8x32xf32> -> vector<8x32xf32>
    %220 = arith.truncf %219 : vector<8x32xf32> to vector<8x32xbf16>
    %221 = vector.extract_strided_slice %39 {offsets = [96, 0], sizes = [32, 128], strides = [1, 1]} : vector<128x128xbf16> to vector<32x128xbf16>
    %cst_67 = arith.constant dense<0.000000e+00> : vector<8x128xf32>
    %222 = tpu.matmul %220, %221, %cst_67 {dimension_numbers = #tpu.dot_dimension_numbers<[1], [0], [0], [1], [0, 0, 1, 1], [], []>} : vector<8x32xbf16>, vector<32x128xbf16>, vector<8x128xf32> -> vector<8x128xf32>
    %223 = arith.addf %201, %222 : vector<8x128xf32>
    %224 = tpu.concatenate %131, %223 in 0 : vector<8x128xf32>, vector<8x128xf32> -> vector<16x128xf32>
    %225 = arith.addf %0, %224 : vector<16x128xf32>
    %c0_68 = arith.constant 0 : index
    %c0_69 = arith.constant 0 : index
    %226 = vector.load %arg8[%c0_68, %c0_69] : memref<1x128xf32, #tpu.memory_space<vmem>>, vector<1x128xf32>
    %227 = arith.mulf %225, %225 : vector<16x128xf32>
    %cst_70 = arith.constant dense<0.000000e+00> : vector<16xf32>
    %228 = vector.multi_reduction <add>, %227, %cst_70 [1] : vector<16x128xf32> to vector<16xf32>
    %229 = vector.shape_cast %228 : vector<16xf32> to vector<16x1xf32>
    %cst_71 = arith.constant 1.280000e+02 : f32
    %230 = vector.broadcast %cst_71 : f32 to vector<16x1xf32>
    %231 = arith.divf %229, %230 : vector<16x1xf32>
    %cst_72 = arith.constant 9.99999997E-7 : f32
    %232 = vector.broadcast %cst_72 : f32 to vector<16x1xf32>
    %233 = arith.addf %231, %232 : vector<16x1xf32>
    %234 = math.rsqrt %233 : vector<16x1xf32>
    %235 = vector.broadcast %234 : vector<16x1xf32> to vector<16x128xf32>
    %236 = arith.mulf %225, %235 : vector<16x128xf32>
    %237 = vector.broadcast %226 : vector<1x128xf32> to vector<16x128xf32>
    %238 = arith.mulf %236, %237 : vector<16x128xf32>
    %239 = arith.truncf %238 : vector<16x128xf32> to vector<16x128xbf16>
    %c0_73 = arith.constant 0 : index
    %c0_74 = arith.constant 0 : index
    %240 = vector.load %arg9[%c0_73, %c0_74] : memref<128x512xbf16, #tpu.memory_space<vmem>>, vector<128x512xbf16>
    %cst_75 = arith.constant dense<0.000000e+00> : vector<16x512xf32>
    %241 = tpu.matmul %239, %240, %cst_75 {dimension_numbers = #tpu.dot_dimension_numbers<[1], [0], [0], [1], [0, 0, 1, 1], [], []>} : vector<16x128xbf16>, vector<128x512xbf16>, vector<16x512xf32> -> vector<16x512xf32>
    %242 = vector.extract_strided_slice %241 {offsets = [0, 0], sizes = [16, 256], strides = [1, 1]} : vector<16x512xf32> to vector<16x256xf32>
    %243 = vector.extract_strided_slice %241 {offsets = [0, 256], sizes = [16, 256], strides = [1, 1]} : vector<16x512xf32> to vector<16x256xf32>
    %244 = arith.negf %242 : vector<16x256xf32>
    %245 = math.exp %244 : vector<16x256xf32>
    %cst_76 = arith.constant 1.000000e+00 : f32
    %246 = vector.broadcast %cst_76 : f32 to vector<16x256xf32>
    %247 = arith.addf %246, %245 : vector<16x256xf32>
    %248 = arith.divf %246, %247 : vector<16x256xf32>
    %249 = arith.mulf %242, %248 : vector<16x256xf32>
    %250 = arith.mulf %249, %243 : vector<16x256xf32>
    %251 = arith.truncf %250 : vector<16x256xf32> to vector<16x256xbf16>
    %c0_77 = arith.constant 0 : index
    %c0_78 = arith.constant 0 : index
    %252 = vector.load %arg10[%c0_77, %c0_78] : memref<256x128xbf16, #tpu.memory_space<vmem>>, vector<256x128xbf16>
    %cst_79 = arith.constant dense<0.000000e+00> : vector<16x128xf32>
    %253 = tpu.matmul %251, %252, %cst_79 {dimension_numbers = #tpu.dot_dimension_numbers<[1], [0], [0], [1], [0, 0, 1, 1], [], []>} : vector<16x256xbf16>, vector<256x128xbf16>, vector<16x128xf32> -> vector<16x128xf32>
    %254 = arith.addf %225, %253 : vector<16x128xf32>
    %c0_80 = arith.constant 0 : index
    %c0_81 = arith.constant 0 : index
    %255 = vector.load %arg11[%c0_80, %c0_81] : memref<16x128xf32, #tpu.memory_space<vmem>>, vector<16x128xf32>
    tpu.vector_store %arg11[%c0_80, %c0_81], %254 {strides = array<i32>} : memref<16x128xf32, #tpu.memory_space<vmem>>, vector<16x128xf32>,
    return
  }
  func.func @transform_0(%arg0: i32) -> (i32, i32) {
    %c0_i32 = arith.constant 0 : i32
    %c0_i32_0 = arith.constant 0 : i32
    return %arg0, %c0_i32 : i32, i32
  }
  func.func @transform_1(%arg0: i32) -> (i32, i32) {
    %c0_i32 = arith.constant 0 : i32
    %c0_i32_0 = arith.constant 0 : i32
    %c0_i32_1 = arith.constant 0 : i32
    return %c0_i32, %c0_i32_0 : i32, i32
  }
  func.func @transform_2(%arg0: i32) -> (i32, i32) {
    %c0_i32 = arith.constant 0 : i32
    %c0_i32_0 = arith.constant 0 : i32
    %c0_i32_1 = arith.constant 0 : i32
    return %c0_i32, %c0_i32_0 : i32, i32
  }
  func.func @transform_3(%arg0: i32) -> (i32, i32) {
    %c0_i32 = arith.constant 0 : i32
    %c0_i32_0 = arith.constant 0 : i32
    %c0_i32_1 = arith.constant 0 : i32
    return %c0_i32, %c0_i32_0 : i32, i32
  }
  func.func @transform_4(%arg0: i32) -> (i32, i32) {
    %c0_i32 = arith.constant 0 : i32
    %c0_i32_0 = arith.constant 0 : i32
    return %arg0, %c0_i32 : i32, i32
  }
  func.func @transform_5(%arg0: i32) -> (i32, i32) {
    %c0_i32 = arith.constant 0 : i32
    %c0_i32_0 = arith.constant 0 : i32
    return %arg0, %c0_i32 : i32, i32
  }
  func.func @transform_6(%arg0: i32) -> (i32, i32) {
    %c0_i32 = arith.constant 0 : i32
    %c0_i32_0 = arith.constant 0 : i32
    %c0_i32_1 = arith.constant 0 : i32
    return %c0_i32, %c0_i32_0 : i32, i32
  }
  func.func @transform_7(%arg0: i32) -> (i32, i32) {
    %c0_i32 = arith.constant 0 : i32
    %c0_i32_0 = arith.constant 0 : i32
    %c0_i32_1 = arith.constant 0 : i32
    return %c0_i32, %c0_i32_0 : i32, i32
  }
  func.func @transform_8(%arg0: i32) -> (i32, i32) {
    %c0_i32 = arith.constant 0 : i32
    %c0_i32_0 = arith.constant 0 : i32
    %c0_i32_1 = arith.constant 0 : i32
    return %c0_i32, %c0_i32_0 : i32, i32
  }
  func.func @transform_9(%arg0: i32) -> (i32, i32) {
    %c0_i32 = arith.constant 0 : i32
    %c0_i32_0 = arith.constant 0 : i32
    %c0_i32_1 = arith.constant 0 : i32
    return %c0_i32, %c0_i32_0 : i32, i32
  }
  func.func @transform_10(%arg0: i32) -> (i32, i32) {
    %c0_i32 = arith.constant 0 : i32
    %c0_i32_0 = arith.constant 0 : i32
    return %arg0, %c0_i32 : i32, i32
  }
}

</mosaic_0001>

<bundles_post_ra>
// kernel: tpu_custom_call.1
= control target key start
LH: loop header
LB: loop body
LE: loop exit
PB: predicated region body
PF: predicated region fallthrough
CT: control target
= control target key end

     0   :  { %15 = vsyncpa [#allocation3], 0  ;;  %s3203_s0 = inlined_call_operand.hbm [shape: f32[16,128], index: 0, kind: input, shape index: {}]   ;;  %s3204_s1 = inlined_call_operand.vmem [shape: f32[1,128], index: 1, kind: input, shape index: {}]   ;;  %s3205_s2 = inlined_call_operand.vmem [shape: bf16[128,448], index: 2, kind: input, shape index: {}]   ;;  %s3206_s3 = inlined_call_operand.vmem [shape: f32[192,192], index: 3, kind: input, shape index: {}]   ;;  %s3207_s4 = inlined_call_operand.vmem [shape: f32[16,192], index: 4, kind: input, shape index: {}]   ;;  %s3208_s5 = inlined_call_operand.hbm [shape: f32[16,192], index: 5, kind: input, shape index: {}]   ;;  %s3209_s6 = inlined_call_operand.vmem [shape: bf16[128,128], index: 6, kind: input, shape index: {}]   ;;  %s3210_s7 = inlined_call_operand.vmem [shape: f32[1,128], index: 7, kind: input, shape index: {}]   ;;  %s3211_s8 = inlined_call_operand.hbm [shape: bf16[128,512], index: 8, kind: input, shape index: {}]   ;;  %s3212_s9 = inlined_call_operand.hbm [shape: bf16[256,128], index: 9, kind: input, shape index: {}]   ;;  %s3213_s10 = inlined_call_operand.hbm [shape: f32[16,128], index: 10, kind: output, shape index: {}]  }
   0x1   :  { %16 = vsyncpa [#allocation6], 0 }
   0x2   :  { %17 = vsyncpa [#allocation9], 0  ;;  %s44_s15 = sshll.u32 %s3208_s5, 4  ;;  %s45_s15 = int_to_ptr.hbm [resolvable:$true] %s44_s15 }
   0x3   :  { %18 = vsyncpa [#allocation4], 0  ;;  %s2491_s16 = smov [#allocation5]   ;;  %s23_s20 = sshll.u32 %s3203_s0, 4  ;;  %s24_s20 = int_to_ptr.hbm [resolvable:$true] %s23_s20 }
   0x4   :  { %s46_s17 = sshll.u32 %s2491_s16, 4  ;;  %s2492_s21 = smov 256   ;;  %s47_s17 = int_to_ptr.vmem [resolvable:$true] %s46_s17 }
   0x5   :  { %s2493_s22 = smov 16   ;;  %s2494_s23 = smov [#allocation2]  }
   0x6   :  { %52 = dma.hbm_to_vmem [thread:$0]  %s45_s15, 512, %s47_s17, [#allocation6], %s2492_s21, %s2492_s21, %s2493_s22  }
   0x7   :  { %s25_s24 = sshll.u32 %s2494_s23, 4  ;;  %s2495_s25 = smov 128   ;;  %s26_s24 = int_to_ptr.vmem [resolvable:$true] %s25_s24 }
   0x8   :  { %s2496_s26 = smov 8   ;;  %s61_s28 = sshll.u32 %s3211_s8, 4  ;;  %s62_s28 = int_to_ptr.hbm [resolvable:$true] %s61_s28 }
   0x9   :  { %31 = dma.hbm_to_vmem [thread:$0]  %s24_s20, 256, %s26_s24, [#allocation3], %s2495_s25, %s2495_s25, %s2496_s26  }
   0xa   :  { %s2497_s29 = smov [#allocation7]   ;;  %s74_s12 = sshll.u32 %s3212_s9, 4  ;;  %s75_s12 = int_to_ptr.hbm [resolvable:$true] %s74_s12 }
   0xb   :  { %s63_s0 = sshll.u32 %s2497_s29, 4  ;;  %s2498_s13 = smov [#allocation8]   ;;  %s64_s0 = int_to_ptr.vmem [resolvable:$true] %s63_s0 }
   0xc   :  { %69 = dma.hbm_to_vmem [thread:$0]  %s62_s28, 4096, %s64_s0, [#allocation6], %s2492_s21, %s2492_s21, %s2493_s22  }
   0xd   :  { %s76_s14 = sshll.u32 %s2498_s13, 4  ;;  %s2499_s15 = smov 64   ;;  %s77_s14 = int_to_ptr.vmem [resolvable:$true] %s76_s14 }
   0xe   :  { %s2500_s16 = smov 4  }
   0xf   :  { %82 = dma.hbm_to_vmem [thread:$0]  %s75_s12, 2048, %s77_s14, [#allocation9], %s2499_s15, %s2499_s15, %s2500_s16  }
  0x10   :  { %2483 = dma.done.wait [#allocation3], 256  }
  0x11   :  { %2484 = vsyncadd [#allocation3], 4294967040 }
  0x12   :  { %2485 = dma.done.wait [#allocation6], 4608  }
  0x13   :  { %2486 = vsyncadd [#allocation6], 4294962688 }
  0x14   :  { %2487 = dma.done.wait [#allocation9], 2048  }
  0x15   :  { %2488 = vsyncadd [#allocation9], 4294965248  ;;  %v2577_v0 = vld [vmem:[#allocation2] sm:$0xff]  ;;  %v2581_v2 = vld [vmem:[#allocation2 + $0x8] sm:$0xff]  ;;  %v2501_v11 = vmov 128.0   ;;  %vm450_vm7 = vcmask 523264  }
  0x16   :  { %v103_v1 = vmul.f32 %v2577_v0, %v2577_v0  ;;  %v104_v3 = vmul.f32 %v2581_v2, %v2581_v2  ;;  %v1921_v4 = vld [vmem:[%s3205_s2 + $0xe0] sm:$0xf]  ;;  %v2221_v5 = vld [vmem:[%s3205_s2 + $0xec] sm:$0xf0]  ;;  %v2219_v6 = vld [vmem:[%s3205_s2 + $0xe4] sm:$0xf]  ;;  %2295 = vrcp.f32 %v2501_v11 }
  0x17   :  { %v1922_v7 = vor.u32 %v2221_v5, %v1921_v4  ;;  %v1923_v8 = vld [vmem:[%s3205_s2 + $0xf0] sm:$0xf0]  ;;  %v1929_v9 = vld [vmem:[%s3205_s2 + $0xe8] sm:$0xf]  ;;  %v2222_v10 = vld [vmem:[%s3205_s2 + $0xf4] sm:$0xf0] }
  0x18   :  { %105 = vadd.xlane.f32.xlu0 %v103_v1  ;;  %v1926_v12 = vor.u32 %v2219_v6, %v1923_v8  ;;  %v1930_v13 = vor.u32 %v2222_v10, %v1929_v9  ;;  %v2220_v14 = vld [vmem:[%s3205_s2 + $0xec] sm:$0xf]  ;;  %v1931_v15 = vld [vmem:[%s3205_s2 + $0xf8] sm:$0xf0]  ;;  %v1905_v17 = vld [vmem:[%s3205_s2 + $0xc0] sm:$0xf] }
  0x19   :  { %340 = vmatpush.bf16.msra.mxu0 %v1922_v7  ;;  %v1934_v16 = vor.u32 %v2220_v14, %v1931_v15  ;;  %v2217_v18 = vld [vmem:[%s3205_s2 + $0xcc] sm:$0xf0]  ;;  %v2215_v19 = vld [vmem:[%s3205_s2 + $0xc4] sm:$0xf]  ;;  %v1907_v21 = vld [vmem:[%s3205_s2 + $0xd0] sm:$0xf0] }
  0x1a   :  { %354 = vmatpush.bf16.msra.mxu1 %v1926_v12  ;;  %368 = vmatpush.bf16.msra.mxu2 %v1930_v13  ;;  %v1906_v20 = vor.u32 %v2217_v18, %v1905_v17  ;;  %v1913_v22 = vld [vmem:[%s3205_s2 + $0xc8] sm:$0xf]  ;;  %v2218_v23 = vld [vmem:[%s3205_s2 + $0xd4] sm:$0xf0]  ;;  %v1910_v24 = vor.u32 %v2215_v19, %v1907_v21  ;;  %v2216_v26 = vld [vmem:[%s3205_s2 + $0xcc] sm:$0xf] }
  0x1b   :  { %382 = vmatpush.bf16.msra.mxu3 %v1934_v16  ;;  %v1914_v25 = vor.u32 %v2218_v23, %v1913_v22  ;;  %v1915_v27 = vld [vmem:[%s3205_s2 + $0xd8] sm:$0xf0]  ;;  %v1889_v30 = vld [vmem:[%s3205_s2 + $0xa0] sm:$0xf]  ;;  %v2213_v31 = vld [vmem:[%s3205_s2 + $0xac] sm:$0xf0] }
  0x1c   :  { %v1918_v28 = vor.u32 %v2216_v26, %v1915_v27  ;;  %v2633_v29 = vpop.eup %2295  ;;  %v2211_v32 = vld [vmem:[%s3205_s2 + $0xa4] sm:$0xf]  ;;  %v1890_v33 = vor.u32 %v2213_v31, %v1889_v30  ;;  %v1891_v34 = vld [vmem:[%s3205_s2 + $0xb0] sm:$0xf0]  ;;  %v1897_v35 = vld [vmem:[%s3205_s2 + $0xa8] sm:$0xf] }
  0x1d   :  { %341 = vmatpush.bf16.msra.mxu0 %v1906_v20  ;;  %v2214_v36 = vld [vmem:[%s3205_s2 + $0xb4] sm:$0xf0]  ;;  %v1894_v37 = vor.u32 %v2211_v32, %v1891_v34  ;;  %v2212_v39 = vld [vmem:[%s3205_s2 + $0xac] sm:$0xf]  ;;  %v1899_v40 = vld [vmem:[%s3205_s2 + $0xb8] sm:$0xf0]  ;;  %vm114_vm0 = vweird.f32 %v2633_v29 }
  0x1e   :  { %355 = vmatpush.bf16.msra.mxu1 %v1910_v24  ;;  %369 = vmatpush.bf16.msra.mxu2 %v1914_v25  ;;  %v1898_v38 = vor.u32 %v2214_v36, %v1897_v35  ;;  %v110_v41 = vmul.f32 128.0, %v2633_v29  ;;  %v1902_v42 = vor.u32 %v2212_v39, %v1899_v40  ;;  %v1873_v43 = vld [vmem:[%s3205_s2 + $0x80] sm:$0xf]  ;;  %v2209_v44 = vld [vmem:[%s3205_s2 + $0x8c] sm:$0xf0]  ;;  %vm639_vm14 = vcmask 261120  }
  0x1f   :  { %383 = vmatpush.bf16.msra.mxu3 %v1918_v28  ;;  %v2207_v45 = vld [vmem:[%s3205_s2 + $0x84] sm:$0xf]  ;;  %v1874_v46 = vor.u32 %v2209_v44, %v1873_v43  ;;  %v1875_v47 = vld [vmem:[%s3205_s2 + $0x90] sm:$0xf0]  ;;  %v1881_v48 = vld [vmem:[%s3205_s2 + $0x88] sm:$0xf] }
  0x20   :  { %107 = vadd.xlane.f32.xlu0 %v104_v3  ;;  %v2210_v49 = vld [vmem:[%s3205_s2 + $0x94] sm:$0xf0]  ;;  %v1878_v50 = vor.u32 %v2207_v45, %v1875_v47  ;;  %v2208_v52 = vld [vmem:[%s3205_s2 + $0x8c] sm:$0xf]  ;;  %v1883_v53 = vld [vmem:[%s3205_s2 + $0x98] sm:$0xf0] }
  0x21   :  { %342 = vmatpush.bf16.msra.mxu0 %v1890_v33  ;;  %v1882_v51 = vor.u32 %v2210_v49, %v1881_v48  ;;  %v111_v54 = vsub.f32 1.0, %v110_v41  ;;  %v1886_v55 = vor.u32 %v2208_v52, %v1883_v53  ;;  %v1857_v56 = vld [vmem:[%s3205_s2 + $0x60] sm:$0xf]  ;;  %v2205_v57 = vld [vmem:[%s3205_s2 + $0x6c] sm:$0xf0]  ;;  %v433_v49 = vld [vmem:[%s3206_s3 + $0xf8] sm:$0xff] }
  0x22   :  { %356 = vmatpush.bf16.msra.mxu1 %v1894_v37  ;;  %370 = vmatpush.bf16.msra.mxu2 %v1898_v38  ;;  %v2203_v58 = vld [vmem:[%s3205_s2 + $0x64] sm:$0xf]  ;;  %v1858_v59 = vor.u32 %v2205_v57, %v1857_v56  ;;  %v1859_v60 = vld [vmem:[%s3205_s2 + $0x70] sm:$0xf0]  ;;  %v1865_v61 = vld [vmem:[%s3205_s2 + $0x68] sm:$0xf] }
  0x23   :  { %384 = vmatpush.bf16.msra.mxu3 %v1902_v42  ;;  %v2206_v62 = vld [vmem:[%s3205_s2 + $0x74] sm:$0xf0]  ;;  %v1862_v63 = vor.u32 %v2203_v58, %v1859_v60  ;;  %v2204_v3 = vld [vmem:[%s3205_s2 + $0x6c] sm:$0xf]  ;;  %v1867_v4 = vld [vmem:[%s3205_s2 + $0x78] sm:$0xf0]  ;;  %v112_v5 = vmul.f32 %v2633_v29, %v111_v54 }
  0x24   :  { %v1866_v1 = vor.u32 %v2206_v62, %v1865_v61  ;;  %v1870_v6 = vor.u32 %v2204_v3, %v1867_v4  ;;  %v1841_v7 = vld [vmem:[%s3205_s2 + $0x40] sm:$0xf]  ;;  %v2201_v8 = vld [vmem:[%s3205_s2 + $0x4c] sm:$0xf0]  ;;  %v2199_v9 = vld [vmem:[%s3205_s2 + $0x44] sm:$0xf] }
  0x25   :  { %343 = vmatpush.bf16.msra.mxu0 %v1874_v46  ;;  %v1842_v10 = vor.u32 %v2201_v8, %v1841_v7  ;;  %v1843_v11 = vld [vmem:[%s3205_s2 + $0x50] sm:$0xf0]  ;;  %v1849_v12 = vld [vmem:[%s3205_s2 + $0x48] sm:$0xf]  ;;  %v2202_v13 = vld [vmem:[%s3205_s2 + $0x54] sm:$0xf0]  ;;  %v113_v18 = vadd.f32 %v2633_v29, %v112_v5 }
  0x26   :  { %357 = vmatpush.bf16.msra.mxu1 %v1878_v50  ;;  %371 = vmatpush.bf16.msra.mxu2 %v1882_v51  ;;  %v1846_v14 = vor.u32 %v2199_v9, %v1843_v11  ;;  %v1850_v15 = vor.u32 %v2202_v13, %v1849_v12  ;;  %v2200_v16 = vld [vmem:[%s3205_s2 + $0x4c] sm:$0xf]  ;;  %v1851_v17 = vld [vmem:[%s3205_s2 + $0x58] sm:$0xf0]  ;;  %v1825_v20 = vld [vmem:[%s3205_s2 + $0x20] sm:$0xf] }
  0x27   :  { %385 = vmatpush.bf16.msra.mxu3 %v1886_v55  ;;  %v1854_v19 = vor.u32 %v2200_v16, %v1851_v17  ;;  %v2197_v21 = vld [vmem:[%s3205_s2 + $0x2c] sm:$0xf0]  ;;  %v2195_v22 = vld [vmem:[%s3205_s2 + $0x24] sm:$0xf]  ;;  %v1827_v24 = vld [vmem:[%s3205_s2 + $0x30] sm:$0xf0]  ;;  %v2760_v32 = vsel %vm114_vm0, %v2633_v29, %v113_v18 }
  0x28   :  { %v1826_v23 = vor.u32 %v2197_v21, %v1825_v20  ;;  %v1833_v25 = vld [vmem:[%s3205_s2 + $0x28] sm:$0xf]  ;;  %v2198_v26 = vld [vmem:[%s3205_s2 + $0x34] sm:$0xf0]  ;;  %v1830_v27 = vor.u32 %v2195_v22, %v1827_v24  ;;  %v2196_v30 = vld [vmem:[%s3205_s2 + $0x2c] sm:$0xf] }
  0x29   :  { %344 = vmatpush.bf16.msra.mxu0 %v1858_v59  ;;  %v1834_v28 = vor.u32 %v2198_v26, %v1833_v25  ;;  %v1835_v31 = vld [vmem:[%s3205_s2 + $0x38] sm:$0xf0]  ;;  %v1809_v34 = vld [vmem:[%s3205_s2] sm:$0xf]  ;;  %v2193_v35 = vld [vmem:[%s3205_s2 + $0xc] sm:$0xf0] }
  0x2a   :  { %358 = vmatpush.bf16.msra.mxu1 %v1862_v63  ;;  %372 = vmatpush.bf16.msra.mxu2 %v1866_v1  ;;  %v1838_v33 = vor.u32 %v2196_v30, %v1835_v31  ;;  %v2191_v36 = vld [vmem:[%s3205_s2 + $0x4] sm:$0xf]  ;;  %v1810_v29 = vor.u32 %v2193_v35, %v1809_v34  ;;  %v1811_v38 = vld [vmem:[%s3205_s2 + $0x10] sm:$0xf0]  ;;  %v1817_v39 = vld [vmem:[%s3205_s2 + $0x8] sm:$0xf] }
  0x2b   :  { %386 = vmatpush.bf16.msra.mxu3 %v1870_v6  ;;  %v2194_v40 = vld [vmem:[%s3205_s2 + $0x14] sm:$0xf0]  ;;  %v1814_v42 = vor.u32 %v2191_v36, %v1811_v38  ;;  %v2192_v44 = vld [vmem:[%s3205_s2 + $0xc] sm:$0xf]  ;;  %v1819_v45 = vld [vmem:[%s3205_s2 + $0x18] sm:$0xf0] }
  0x2c   :  { %v1818_v43 = vor.u32 %v2194_v40, %v1817_v39  ;;  %v1822_v46 = vor.u32 %v2192_v44, %v1819_v45  ;;  %v432_v48 = vld [vmem:[%s3206_s3 + $0xf0] sm:$0xff]  ;;  %v430_v50 = vld [vmem:[%s3206_s3 + $0xe0] sm:$0xff]  ;;  %v431_v51 = vld [vmem:[%s3206_s3 + $0xe8] sm:$0xff]  ;;  %s2502_s29 = smov 96   ;;  %vm660_vm0 = vcmask 64512   ;;  %s2503_s0 = smov 32  }
  0x2d   :  { %345 = vmatpush.bf16.msra.mxu0 %v1842_v10  ;;  %v428_v53 = vld [vmem:[%s3206_s3 + $0xd0] sm:$0xff]  ;;  %v429_v54 = vld [vmem:[%s3206_s3 + $0xd8] sm:$0xff]  ;;  %v426_v56 = vld [vmem:[%s3206_s3 + $0xc0] sm:$0xff] }
  0x2e   :  { %359 = vmatpush.bf16.msra.mxu1 %v1846_v14  ;;  %373 = vmatpush.bf16.msra.mxu2 %v1850_v15  ;;  %v427_v57 = vld [vmem:[%s3206_s3 + $0xc8] sm:$0xff]  ;;  %v448_v60 = vld [vmem:[%s3206_s3 + $0x170] sm:$0xff]  ;;  %v425_v63 = vld [vmem:[%s3206_s3 + $0xb8] sm:$0xff] }
  0x2f   :  { %387 = vmatpush.bf16.msra.mxu3 %v1854_v19  ;;  %v424_v62 = vld [vmem:[%s3206_s3 + $0xb0] sm:$0xff]  ;;  %v449_v1 = vld [vmem:[%s3206_s3 + $0x178] sm:$0xff]  ;;  %v422_v3 = vld [vmem:[%s3206_s3 + $0xa0] sm:$0xff] }
  0x30   :  { %v446_v4 = vld [vmem:[%s3206_s3 + $0x160] sm:$0xff]  ;;  %v423_v6 = vld [vmem:[%s3206_s3 + $0xa8] sm:$0xff]  ;;  %v444_v8 = vld [vmem:[%s3206_s3 + $0x150] sm:$0xff] }
  0x31   :  { %346 = vmatpush.bf16.msra.mxu0 %v1826_v23  ;;  %v447_v7 = vld [vmem:[%s3206_s3 + $0x168] sm:$0xff]  ;;  %v445_v9 = vld [vmem:[%s3206_s3 + $0x158] sm:$0xff]  ;;  %v420_v11 = vld [vmem:[%s3206_s3 + $0x90] sm:$0xff] }
  0x32   :  { %360 = vmatpush.bf16.msra.mxu1 %v1830_v27  ;;  %374 = vmatpush.bf16.msra.mxu2 %v1834_v28  ;;  %v421_v12 = vld [vmem:[%s3206_s3 + $0x98] sm:$0xff]  ;;  %v442_v13 = vld [vmem:[%s3206_s3 + $0x140] sm:$0xff]  ;;  %v443_v14 = vld [vmem:[%s3206_s3 + $0x148] sm:$0xff] }
  0x33   :  { %388 = vmatpush.bf16.msra.mxu3 %v1838_v33  ;;  %v440_v15 = vld [vmem:[%s3206_s3 + $0x130] sm:$0xff]  ;;  %v418_v17 = vld [vmem:[%s3206_s3 + $0x80] sm:$0xff]  ;;  %v419_v18 = vld [vmem:[%s3206_s3 + $0x88] sm:$0xff] }
  0x34   :  { %v441_v20 = vld [vmem:[%s3206_s3 + $0x138] sm:$0xff]  ;;  %v438_v21 = vld [vmem:[%s3206_s3 + $0x120] sm:$0xff]  ;;  %v416_v23 = vld [vmem:[%s3206_s3 + $0x70] sm:$0xff] }
  0x35   :  { %347 = vmatpush.bf16.msra.mxu0 %v1810_v29  ;;  %v417_v24 = vld [vmem:[%s3206_s3 + $0x78] sm:$0xff]  ;;  %v439_v25 = vld [vmem:[%s3206_s3 + $0x128] sm:$0xff]  ;;  %v414_v28 = vld [vmem:[%s3206_s3 + $0x60] sm:$0xff] }
  0x36   :  { %361 = vmatpush.bf16.msra.mxu1 %v1814_v42  ;;  %375 = vmatpush.bf16.msra.mxu2 %v1818_v43  ;;  %v415_v30 = vld [vmem:[%s3206_s3 + $0x68] sm:$0xff]  ;;  %v412_v33 = vld [vmem:[%s3206_s3 + $0x50] sm:$0xff]  ;;  %v413_v34 = vld [vmem:[%s3206_s3 + $0x58] sm:$0xff] }
  0x37   :  { %389 = vmatpush.bf16.msra.mxu3 %v1822_v46  ;;  %v411_v29 = vld [vmem:[%s3206_s3 + $0x48] sm:$0xff]  ;;  %v408_v39 = vld [vmem:[%s3206_s3 + $0x30] sm:$0xff]  ;;  %v409_v40 = vld [vmem:[%s3206_s3 + $0x38] sm:$0xff] }
  0x38   :  { %v2293_v42 = vld [vmem:[%s3204_s1] ss:$0 sm:$0xff]  ;;  %v407_v45 = vld [vmem:[%s3206_s3 + $0x28] sm:$0xff] }
  0x39   :  { %457 = vmatpush.msrb.mxu0 %v432_v48  ;;  %v406_v44 = vld [vmem:[%s3206_s3 + $0x20] sm:$0xff] }
  0x3a   :  { %503 = vmatpush.msrb.mxu2 %v433_v49  ;;  %488 = vmatpush.msrb.mxu1 %v448_v60  ;;  %v404_v49 = vld [vmem:[%s3206_s3 + $0x10] sm:$0xff] }
  0x3b   :  { %458 = vmatpush.msrb.mxu0 %v430_v50  ;;  %534 = vmatpush.msrb.mxu3 %v449_v1  ;;  %v436_v50 = vld [vmem:[%s3206_s3 + $0x110] sm:$0xff] }
  0x3c   :  { %504 = vmatpush.msrb.mxu2 %v431_v51  ;;  %489 = vmatpush.msrb.mxu1 %v446_v4  ;;  %v437_v51 = vld [vmem:[%s3206_s3 + $0x118] sm:$0xff] }
  0x3d   :  { %459 = vmatpush.msrb.mxu0 %v428_v53  ;;  %535 = vmatpush.msrb.mxu3 %v447_v7  ;;  %v434_v53 = vld [vmem:[%s3206_s3 + $0x100] sm:$0xff] }
  0x3e   :  { %505 = vmatpush.msrb.mxu2 %v429_v54  ;;  %490 = vmatpush.msrb.mxu1 %v444_v8  ;;  %v403_v54 = vld [vmem:[%s3206_s3 + $0x8] sm:$0xff] }
  0x3f   :  { %460 = vmatpush.msrb.mxu0 %v426_v56  ;;  %536 = vmatpush.msrb.mxu3 %v445_v9 }
  0x40   :  { %506 = vmatpush.msrb.mxu2 %v427_v57  ;;  %491 = vmatpush.msrb.mxu1 %v442_v13 }
  0x41   :  { %461 = vmatpush.msrb.mxu0 %v424_v62  ;;  %537 = vmatpush.msrb.mxu3 %v443_v14 }
  0x42   :  { %507 = vmatpush.msrb.mxu2 %v425_v63  ;;  %492 = vmatpush.msrb.mxu1 %v440_v15 }
  0x43   :  { %462 = vmatpush.msrb.mxu0 %v422_v3  ;;  %538 = vmatpush.msrb.mxu3 %v441_v20 }
  0x44   :  { %508 = vmatpush.msrb.mxu2 %v423_v6  ;;  %493 = vmatpush.msrb.mxu1 %v438_v21  ;;  %v597_v21 = vld [vmem:[#allocation5] sm:$0xff] }
  0x45   :  { %463 = vmatpush.msrb.mxu0 %v420_v11  ;;  %539 = vmatpush.msrb.mxu3 %v439_v25  ;;  %v590_v25 = vld [vmem:[%s3207_s4 + $0x8] sm:$0xff] }
  0x46   :  { %509 = vmatpush.msrb.mxu2 %v421_v12  ;;  %494 = vmatpush.msrb.mxu1 %v436_v50 }
  0x47   :  { %464 = vmatpush.msrb.mxu0 %v418_v17  ;;  %540 = vmatpush.msrb.mxu3 %v437_v51 }
  0x48   :  { %510 = vmatpush.msrb.mxu2 %v419_v18  ;;  %495 = vmatpush.msrb.mxu1 %v434_v53  ;;  %v615_v53 = vlaneseq }
  0x49   :  { %465 = vmatpush.msrb.mxu0 %v416_v23 }
  0x4a   :  { %511 = vmatpush.msrb.mxu2 %v417_v24  ;;  %v589_v24 = vld [vmem:[%s3207_s4] sm:$0xff] }
  0x4b   :  { %466 = vmatpush.msrb.mxu0 %v414_v28 }
  0x4c   :  { %512 = vmatpush.msrb.mxu2 %v415_v30 }
  0x4d   :  { %467 = vmatpush.msrb.mxu0 %v412_v33 }
  0x4e   :  { %513 = vmatpush.msrb.mxu2 %v413_v34 }
  0x50   :  { %514 = vmatpush.msrb.mxu2 %v411_v29 }
  0x52   :  { %515 = vmatpush.msrb.mxu2 %v409_v40 }
  0x54   :  { %516 = vmatpush.msrb.mxu2 %v407_v45 }
  0x8b   :  { %v106_v37 = vpop.xlane.xlu0 %105 }
  0x8c   :  { %v116_v41 = vmul.f32 %v2760_v32, %v106_v37  ;;  %v410_v37 = vld [vmem:[%s3206_s3 + $0x40] sm:$0xff] }
  0x8d   :  { %468 = vmatpush.msrb.mxu0 %v410_v37 }
  0x8e   :  { %v2787_v47 = vadd.f32 1e-06, %v116_v41 }
  0x8f   :  { %469 = vmatpush.msrb.mxu0 %v408_v39 }
  0x90   :  { %2297 = vrsqrt.f32 %v2787_v47  ;;  %vm126_vm2 = vweird.f32 %v2787_v47 }
  0x91   :  { %470 = vmatpush.msrb.mxu0 %v406_v44 }
  0x93   :  { %v108_v52 = vpop.xlane.xlu0 %107  ;;  %471 = vmatpush.msrb.mxu0 %v404_v49 }
  0x94   :  { %v117_v55 = vmul.f32 %v2760_v32, %v108_v52  ;;  %v402_v52 = vld [vmem:[%s3206_s3] sm:$0xff] }
  0x95   :  { %472 = vmatpush.msrb.mxu0 %v402_v52 }
  0x96   :  { %v2815_v58 = vpop.eup %2297  ;;  %v2817_v59 = vadd.f32 1e-06, %v117_v55  ;;  %v435_v55 = vld [vmem:[%s3206_s3 + $0x108] sm:$0xff] }
  0x97   :  { %v121_v61 = vmul.f32 %v2815_v58, %v2787_v47  ;;  %vm127_vm1 = vweird.f32 %v2815_v58  ;;  %541 = vmatpush.msrb.mxu3 %v435_v55  ;;  %v618_v55 = vand.u32 127, %v615_v53 }
  0x98   :  { %2299 = vrsqrt.f32 %v2817_v59  ;;  %vm128_vm3 = vmor %vm126_vm2, %vm127_vm1  ;;  %vm136_vm5 = vweird.f32 %v2817_v59 }
  0x99   :  { %v122_v5 = vmul.f32 %v2815_v58, %v121_v61 }
  0x9b   :  { %v123_v10 = vmul.f32 0.5, %v122_v5 }
  0x9d   :  { %v124_v16 = vsub.f32 1.5, %v123_v10 }
  0x9e   :  { %v2300_v19 = vpop.eup %2299 }
  0x9f   :  { %v131_v22 = vmul.f32 %v2300_v19, %v2817_v59  ;;  %v125_v26 = vmul.f32 %v2815_v58, %v124_v16  ;;  %vm137_vm4 = vweird.f32 %v2300_v19 }
  0xa0   :  { %vm138_vm6 = vmor %vm136_vm5, %vm137_vm4 }
  0xa1   :  { %v132_v27 = vmul.f32 %v2300_v19, %v131_v22  ;;  %v129_v35 = vsel %vm128_vm3, %v2815_v58, %v125_v26  ;;  %v598_v22 = vld [vmem:[#allocation5 + $0x8] sm:$0xff] }
  0xa2   :  { %v140_v41 = vmul.f32 %v129_v35, %v2577_v0 }
  0xa3   :  { %v133_v31 = vmul.f32 0.5, %v132_v27 }
  0xa4   :  { %v145_v0 = vmul.f32 %v2293_v42, %v140_v41 }
  0xa5   :  { %v134_v36 = vsub.f32 1.5, %v133_v31 }
  0xa7   :  { %v135_v38 = vmul.f32 %v2300_v19, %v134_v36 }
  0xa9   :  { %v139_v43 = vsel %vm138_vm6, %v2300_v19, %v135_v38 }
  0xaa   :  { %v141_v46 = vmul.f32 %v139_v43, %v2581_v2  ;;  %v405_v2 = vld [vmem:[%s3206_s3 + $0x18] sm:$0xff] }
  0xab   :  { %517 = vmatpush.msrb.mxu2 %v405_v2 }
  0xac   :  { %v146_v47 = vmul.f32 %v2293_v42, %v141_v46 }
  0xad   :  { %518 = vmatpush.msrb.mxu2 %v403_v54  ;;  %v616_v54 = vshrl.u32 %v615_v53, 7 }
  0xae   :  { %v147_v48 = vpack.c.bf16 %v146_v47, %v145_v0 }
  0xaf   :  { %vm2990_vm15 = vcmp.ge.s32.totalorder %v616_v54, %v618_v55 }
  0xb0   :  { %348 = vmatmul.bf16.vlgmr.msra.gmra.mxu0 %v147_v48  ;;  %362 = vmatmul.bf16.vlgmr.msra.gmra.mxu1 %v147_v48 }
  0xb1   :  { %376 = vmatmul.bf16.vlgmr.msra.gmra.mxu2 %v147_v48  ;;  %390 = vmatmul.bf16.vlgmr.msra.gmra.mxu3 %v147_v48 }
 0x12d   :  { %v349_v56 = vpop.f32.mrf.mxu0  ;;  %v2954_v57 = vpop.f32.mrf.mxu1 }
 0x12e   :  { %v398_v58 = vmul.f32 %v349_v56, %v349_v56  ;;  %v399_v59 = vmul.f32 %v2954_v57, %v2954_v57  ;;  %v593_v33 = vmul.f32 %v589_v24, %v349_v56  ;;  %v594_v34 = vmul.f32 %v590_v25, %v2954_v57  ;;  %v600_v25 = vld [vmem:[#allocation5 + $0x18] sm:$0xff] }
 0x130   :  { %473 = vmatmul.f32.vlgmr.msrb.gmra.mxu0 %v398_v58  ;;  %1935 = vmatmul.msk.f32.vlgmr.msrb.gmra.mxu1 %vm450_vm7, %v399_v59 }
 0x131   :  { %519 = vmatmul.f32.vlgmr.msrb.gmra.mxu2 %v398_v58  ;;  %1937 = vmatmul.msk.f32.vlgmr.msrb.gmra.mxu3 %vm450_vm7, %v399_v59 }
 0x134   :  { %v377_v1 = vpop.f32.mrf.mxu2  ;;  %v391_v3 = vpop.f32.mrf.mxu3 }
 0x135   :  { %v2958_v60 = vpop.f32.mrf.mxu0  ;;  %v2960_v61 = vpop.f32.mrf.mxu1  ;;  %v601_v28 = vmul.f32 %v597_v21, %v377_v1  ;;  %v602_v30 = vmul.f32 %v598_v22, %v391_v3  ;;  %v396_v3 = vpack.c.bf16 %v2954_v57, %v2954_v57 }
 0x136   :  { %v401_v62 = vmul.f32 %v2960_v61, %v2960_v61  ;;  %v400_v63 = vmul.f32 %v2958_v60, %v2958_v60 }
 0x137   :  { %v605_v37 = vadd.f32 %v601_v28, %v593_v33  ;;  %v606_v29 = vadd.f32 %v602_v30, %v594_v34  ;;  %v599_v28 = vld [vmem:[#allocation5 + $0x10] sm:$0xff]  ;;  %v591_v33 = vld [vmem:[%s3207_s4 + $0x10] sm:$0xff] }
 0x138   :  { %476 = vmatmul.f32.gmra.mxu0 %v400_v63  ;;  %1936 = vmatmul.msk.f32.gmra.mxu1 %vm450_vm7, %v401_v62 }
 0x139   :  { %522 = vmatmul.f32.gmra.mxu2 %v400_v63  ;;  %1938 = vmatmul.msk.f32.gmra.mxu3 %vm450_vm7, %v401_v62  ;;  %vm681_vm7 = vcmask 1043456  }
 0x13c   :  { %v2966_v4 = vpop.f32.mrf.mxu2  ;;  %v2968_v6 = vpop.f32.mrf.mxu3 }
 0x1ad   :  { %v474_v5 = vpop.f32.mrf.mxu0  ;;  %v497_v8 = vpop.f32.mrf.mxu1 }
 0x1ae   :  { %v475_v7 = vadd.f32 1e-06, %v474_v5 }
 0x1b0   :  { %v498_v9 = vadd.f32 %v497_v8, %v475_v7  ;;  %v674_v8 = vunpack.c.l.b16 %v396_v3  ;;  %v2228_v3 = vld [vmem:[%s3209_s6 + $0x28] sm:$0xff] }
 0x1b2   :  { %2301 = vrsqrt.f32 %v498_v9  ;;  %vm555_vm9 = vweird.f32 %v498_v9 }
 0x1b4   :  { %v520_v10 = vpop.f32.mrf.mxu2  ;;  %v543_v12 = vpop.f32.mrf.mxu3 }
 0x1b5   :  { %v521_v11 = vadd.f32 1e-06, %v520_v10  ;;  %v500_v49 = vpop.f32.mrf.mxu1  ;;  %v477_v52 = vpop.f32.mrf.mxu0  ;;  %v675_v10 = vpack.c.b16 %v674_v8, %v674_v8 }
 0x1b7   :  { %v544_v13 = vadd.f32 %v543_v12, %v521_v11  ;;  %v478_v12 = vadd.f32 1e-06, %v477_v52 }
 0x1b8   :  { %v2302_v14 = vpop.eup %2301 }
 0x1b9   :  { %v550_v15 = vmul.f32 %v2302_v14, %v498_v9  ;;  %2303 = vrsqrt.f32 %v544_v13  ;;  %vm556_vm8 = vweird.f32 %v2302_v14  ;;  %vm565_vm12 = vweird.f32 %v544_v13 }
 0x1ba   :  { %vm557_vm11 = vmor %vm555_vm9, %vm556_vm8 }
 0x1bb   :  { %v551_v16 = vmul.f32 %v2302_v14, %v550_v15  ;;  %v501_v15 = vadd.f32 %v500_v49, %v478_v12 }
 0x1bc   :  { %v523_v11 = vpop.f32.mrf.mxu2 }
 0x1bd   :  { %v552_v17 = vmul.f32 0.5, %v551_v16  ;;  %v524_v57 = vadd.f32 1e-06, %v523_v11  ;;  %vm575_vm5 = vweird.f32 %v501_v15 }
 0x1bf   :  { %v2304_v18 = vpop.eup %2303  ;;  %v553_v19 = vsub.f32 1.5, %v552_v17 }
 0x1c0   :  { %v560_v20 = vmul.f32 %v2304_v18, %v544_v13  ;;  %vm566_vm10 = vweird.f32 %v2304_v18  ;;  %v546_v13 = vpop.f32.mrf.mxu3 }
 0x1c1   :  { %v554_v26 = vmul.f32 %v2302_v14, %v553_v19  ;;  %vm567_vm13 = vmor %vm565_vm12, %vm566_vm10 }
 0x1c2   :  { %v561_v23 = vmul.f32 %v2304_v18, %v560_v20 }
 0x1c3   :  { %v558_v35 = vsel %vm557_vm11, %v2302_v14, %v554_v26  ;;  %v547_v14 = vadd.f32 %v546_v13, %v524_v57 }
 0x1c4   :  { %v562_v27 = vmul.f32 0.5, %v561_v23  ;;  %v609_v39 = vmul.f32 %v605_v37, %v558_v35 }
 0x1c5   :  { %2305 = vrsqrt.f32 %v547_v14  ;;  %vm585_vm3 = vweird.f32 %v547_v14 }
 0x1c6   :  { %v563_v31 = vsub.f32 1.5, %v562_v27  ;;  %2307 = vrsqrt.f32 %v501_v15  ;;  %v592_v27 = vld [vmem:[%s3207_s4 + $0x18] sm:$0xff] }
 0x1c7   :  { %v596_v35 = vmul.f32 %v592_v27, %v2960_v61 }
 0x1c8   :  { %v564_v36 = vmul.f32 %v2304_v18, %v563_v31  ;;  %v604_v31 = vmul.f32 %v600_v25, %v2968_v6 }
 0x1ca   :  { %v568_v38 = vsel %vm567_vm13, %v2304_v18, %v564_v36  ;;  %v603_v36 = vmul.f32 %v599_v28, %v2966_v4 }
 0x1cb   :  { %v610_v40 = vmul.f32 %v606_v29, %v568_v38  ;;  %v2306_v16 = vpop.eup %2305  ;;  %v595_v29 = vmul.f32 %v591_v33, %v2958_v60  ;;  %v608_v38 = vadd.f32 %v604_v31, %v596_v35 }
 0x1cc   :  { %v2308_v17 = vpop.eup %2307  ;;  %v580_v18 = vmul.f32 %v2306_v16, %v547_v14  ;;  %vm586_vm1 = vweird.f32 %v2306_v16 }
 0x1cd   :  { %v613_v41 = vpack.c.bf16 %v610_v40, %v609_v39  ;;  %v570_v19 = vmul.f32 %v2308_v17, %v501_v15  ;;  %vm576_vm2 = vweird.f32 %v2308_v17  ;;  %vm587_vm4 = vmor %vm585_vm3, %vm586_vm1  ;;  %v607_v6 = vadd.f32 %v603_v36, %v595_v29 }
 0x1ce   :  { %v581_v20 = vmul.f32 %v2306_v16, %v580_v18  ;;  %vm577_vm6 = vmor %vm575_vm5, %vm576_vm2  ;;  %v2227_v18 = vld [vmem:[%s3209_s6 + $0x20] sm:$0xff] }
 0x1cf   :  { %v699_v42 = vunpack.c.l.b16 %v613_v41  ;;  %v637_v43 = vunpack.c.h.b16 %v613_v41  ;;  %v571_v21 = vmul.f32 %v2308_v17, %v570_v19  ;;  %v3052_v19 = vld [vmem:[%s3209_s6 + $0x8] sm:$0xff] }
 0x1d0   :  { %v582_v22 = vmul.f32 0.5, %v581_v20  ;;  %v3058_v20 = vld [vmem:[%s3209_s6] sm:$0xff] }
 0x1d1   :  { %v700_v44 = vpack.c.b16 %v699_v42, %v699_v42  ;;  %v638_v45 = vpack.c.b16 %v637_v43, %v637_v43  ;;  %v572_v23 = vmul.f32 0.5, %v571_v21 }
 0x1d2   :  { %v583_v24 = vsub.f32 1.5, %v582_v22 }
 0x1d3   :  { %805 = vrot.lane.b32.xlu2 %v700_v44, %s2499_s15  ;;  %701 = vrot.lane.b32.xlu1 %v700_v44, %s2502_s29  ;;  %v644_v46 = vsel %vm639_vm14, %v638_v45, 0  ;;  %v573_v26 = vsub.f32 1.5, %v572_v23 }
 0x1d4   :  { %653 = vmatpush.bf16.xpose.msra.mxu1 %v644_v46  ;;  %713 = vmatpush.bf16.xpose.msra.mxu0 %v644_v46  ;;  %v584_v30 = vmul.f32 %v2306_v16, %v583_v24 }
 0x1d5   :  { %v574_v34 = vmul.f32 %v2308_v17, %v573_v26 }
 0x1d6   :  { %v588_v37 = vsel %vm587_vm4, %v2306_v16, %v584_v30 }
 0x1d7   :  { %v578_v39 = vsel %vm577_vm6, %v2308_v17, %v574_v34  ;;  %v612_v40 = vmul.f32 %v608_v38, %v588_v37 }
 0x1db   :  { %807 = vrot.lane.b32.xlu1 %v638_v45, %s2502_s29  ;;  %1939 = vmatmul.msk.bf16.vlgmr.msra.gmra.mxu1 %vm639_vm14, %v613_v41  ;;  %v611_v41 = vmul.f32 %v607_v6, %v578_v39 }
 0x1dd   :  { %v3018_v42 = vpack.c.bf16 %v612_v40, %v611_v41 }
 0x1df   :  { %v970_v45 = vunpack.c.h.b16 %v3018_v42 }
 0x1e1   :  { %v3021_v4 = vpack.c.b16 %v970_v45, %v970_v45 }
 0x22d   :  { %v806_v50 = vpop.permute.xlu2 %805 }
 0x245   :  { %v702_v0 = vpop.permute.xlu1 %701 }
 0x246   :  { %1941 = vmatmul.msk.bf16.vlgmr.msra.gmra.mxu0 %vm639_vm14, %v702_v0 }
 0x24d   :  { %v808_v47 = vpop.permute.xlu1 %807 }
 0x24e   :  { %v2984_v48 = vsel %vm639_vm14, %v808_v47, 0  ;;  %v976_v47 = vsel %vm639_vm14, %v3021_v4, 0 }
 0x24f   :  { %822 = vmatpush.bf16.xpose.msrb.mxu0 %v2984_v48 }
 0x256   :  { %1961 = vmatmul.msk.bf16.vlgmr.msrb.gmra.mxu0 %vm639_vm14, %v806_v50 }
 0x258   :  { %v2988_v2 = vpop.f32.mrf.mxu1 }
 0x259   :  { %v659_v52 = vsel %vm2990_vm15, %v2988_v2, -1e+30  ;;  %v2226_v2 = vld [vmem:[%s3209_s6 + $0x18] sm:$0xff] }
 0x25a   :  { %v661_v55 = vsel %vm660_vm0, %v659_v52, -inf  ;;  %770 = vmatpush.bf16.msra.mxu2 %v2226_v2 }
 0x260   :  { %v657_v51 = vpop.f32.mrf.mxu1 }
 0x2c3   :  { %v715_v58 = vpop.f32.mrf.mxu0 }
 0x2c4   :  { %v719_v59 = vsel %vm2990_vm15, %v715_v58, -1e+30 }
 0x2c5   :  { %v720_v62 = vsel %vm660_vm0, %v719_v59, -inf }
 0x2c6   :  { %721 = vmax.xlane.f32.xlu2 %v720_v62 }
 0x2cb   :  { %v717_v63 = vpop.f32.mrf.mxu0 }
 0x2d3   :  { %v824_v1 = vpop.f32.mrf.mxu0 }
 0x2d4   :  { %v3001_v5 = vsel %vm2990_vm15, %v824_v1, -1e+30  ;;  %v2225_v1 = vld [vmem:[%s3209_s6 + $0x10] sm:$0xff] }
 0x2d5   :  { %v829_v7 = vsel %vm660_vm0, %v3001_v5, -inf  ;;  %771 = vmatpush.bf16.msra.mxu2 %v2225_v1 }
 0x2d6   :  { %830 = vmax.xlane.f32.xlu0 %v829_v7 }
 0x2d9   :  { %884 = vmatpush.bf16.msrb.mxu2 %v2228_v3 }
 0x2db   :  { %v826_v9 = vpop.f32.mrf.mxu0 }
 0x2dd   :  { %885 = vmatpush.bf16.msrb.mxu2 %v2227_v18 }
 0x2de   :  { %841 = vrot.lane.b32.xlu2 %v675_v10, %s2503_s0 }
 0x2e6   :  { %892 = vrot.lane.b32.xlu2 %v700_v44, %s2503_s0 }
 0x2ea   :  { %676 = vrot.lane.b32.xlu0 %v675_v10, %s2499_s15 }
 0x339   :  { %v722_v43 = vpop.xlane.xlu2 %721 }
 0x33a   :  { %v723_v44 = vsub.f32 %v719_v59, %v722_v43  ;;  %v397_v43 = vpack.c.bf16 %v2960_v61, %v2960_v61 }
 0x33c   :  { %v724_v46 = vmul.f32 1.442695, %v723_v44  ;;  %v1005_v44 = vunpack.c.l.b16 %v397_v43 }
 0x33e   :  { %2309 = vpow2.f32 %v724_v46  ;;  %v3078_v45 = vpack.c.b16 %v1005_v44, %v1005_v44  ;;  %v1029_v46 = vunpack.c.l.b16 %v3018_v42 }
 0x341   :  { %v842_v0 = vpop.permute.xlu2 %841 }
 0x342   :  { %v847_v60 = vsel %vm681_vm7, %v842_v0, 0  ;;  %v1030_v0 = vpack.c.b16 %v1029_v46, %v1029_v46 }
 0x343   :  { %933 = vmatpush.bf16.msra.mxu0 %v847_v60 }
 0x344   :  { %v2310_v49 = vpop.eup %2309 }
 0x345   :  { %v726_v50 = vsel %vm660_vm0, %v2310_v49, 0.0 }
 0x346   :  { %727 = vadd.xlane.f32.xlu1 %v726_v50 }
 0x347   :  { %1043 = vmatpush.bf16.xpose.msrb.mxu0 %v976_v47 }
 0x349   :  { %v831_v51 = vpop.xlane.xlu0 %830  ;;  %v893_v38 = vpop.permute.xlu2 %892 }
 0x34a   :  { %v832_v53 = vsub.f32 %v3001_v5, %v831_v51 }
 0x34c   :  { %v833_v54 = vmul.f32 1.442695, %v832_v53 }
 0x34e   :  { %2311 = vpow2.f32 %v833_v54  ;;  %662 = vmax.xlane.f32.xlu1 %v661_v55 }
 0x354   :  { %v2312_v58 = vpop.eup %2311 }
 0x355   :  { %v835_v59 = vsel %vm660_vm0, %v2312_v58, 0.0 }
 0x356   :  { %836 = vadd.xlane.f32.xlu0 %v835_v59 }
 0x35c   :  { %v677_v62 = vpop.permute.xlu0 %676 }
 0x35d   :  { %v683_v63 = vsel %vm681_vm7, %v677_v62, 0 }
 0x35e   :  { %692 = vmatpush.bf16.msra.mxu3 %v683_v63  ;;  %742 = vmatpush.bf16.msrb.mxu1 %v683_v63 }
 0x362   :  { %856 = vmatpush.bf16.msra.mxu1 %v847_v60  ;;  %798 = vmatpush.bf16.msrb.mxu3 %v3052_v19  ;;  %v3089_v60 = vld [vmem:[%s3209_s6 + $0x38] sm:$0xff] }
 0x366   :  { %799 = vmatpush.bf16.msrb.mxu3 %v3058_v20 }
 0x3b9   :  { %v728_v5 = vpop.xlane.xlu1 %727 }
 0x3ba   :  { %2313 = vrcp.f32 %v728_v5 }
 0x3c0   :  { %v2314_v7 = vpop.eup %2313 }
 0x3c1   :  { %v730_v8 = vmul.f32 %v2314_v7, %v2310_v49  ;;  %v663_v9 = vpop.xlane.xlu1 %662 }
 0x3c2   :  { %v664_v10 = vsub.f32 %v659_v52, %v663_v9 }
 0x3c3   :  { %v731_v11 = vpack.c.bf16 %v730_v8, %v730_v8 }
 0x3c4   :  { %v665_v57 = vmul.f32 1.442695, %v664_v10 }
 0x3c5   :  { %1942 = vmatmul.msk.bf16.vlgmr.msrb.gmra.mxu1 %vm660_vm0, %v731_v11 }
 0x3c6   :  { %2315 = vpow2.f32 %v665_v57  ;;  %961 = vmatpush.bf16.msrb.mxu1 %v3089_v60 }
 0x3c9   :  { %v837_v12 = vpop.xlane.xlu0 %836 }
 0x3ca   :  { %2317 = vrcp.f32 %v837_v12 }
 0x3cc   :  { %v2316_v13 = vpop.eup %2315 }
 0x3cd   :  { %v667_v14 = vsel %vm660_vm0, %v2316_v13, 0.0 }
 0x3ce   :  { %668 = vadd.xlane.f32.xlu1 %v667_v14 }
 0x3d0   :  { %v2318_v15 = vpop.eup %2317 }
 0x3d1   :  { %v839_v16 = vmul.f32 %v2318_v15, %v2312_v58 }
 0x3d3   :  { %v840_v17 = vpack.c.bf16 %v839_v16, %v839_v16 }
 0x3d5   :  { %1962 = vmatmul.msk.bf16.vlgmr.msra.gmra.mxu1 %vm660_vm0, %v840_v17 }
 0x441   :  { %v669_v21 = vpop.xlane.xlu1 %668 }
 0x442   :  { %2319 = vrcp.f32 %v669_v21  ;;  %v744_v22 = vpop.f32.mrf.mxu1 }
 0x443   :  { %v748_v23 = vpack.c.bf16 %v744_v22, %v744_v22 }
 0x445   :  { %1951 = vmatmul.msk.bf16.vlgmr.msra.gmra.mxu2 %vm639_vm14, %v748_v23 }
 0x446   :  { %985 = vmatpush.bf16.xpose.msra.mxu2 %v976_v47  ;;  %v3097_v47 = vld [vmem:[%s3209_s6 + $0x30] sm:$0xff] }
 0x447   :  { %962 = vmatpush.bf16.msrb.mxu1 %v3097_v47 }
 0x448   :  { %v2320_v24 = vpop.eup %2319 }
 0x449   :  { %v671_v25 = vmul.f32 %v2320_v24, %v2316_v13 }
 0x44a   :  { %v746_v26 = vpop.f32.mrf.mxu1 }
 0x44b   :  { %v672_v27 = vpack.c.bf16 %v671_v25, %v671_v25 }
 0x44d   :  { %1940 = vmatmul.msk.bf16.vlgmr.msra.gmra.mxu3 %vm660_vm0, %v672_v27 }
 0x44e   :  { %904 = vmatpush.bf16.xpose.msra.mxu3 %v2984_v48 }
 0x452   :  { %v858_v28 = vpop.f32.mrf.mxu1 }
 0x453   :  { %v862_v30 = vpack.c.bf16 %v858_v28, %v858_v28 }
 0x455   :  { %1971 = vmatmul.msk.bf16.vlgmr.msrb.gmra.mxu2 %vm639_vm14, %v862_v30 }
 0x456   :  { %1088 = vmatpush.bf16.msrb.mxu2 %v2226_v2 }
 0x45a   :  { %v860_v31 = vpop.f32.mrf.mxu1  ;;  %1089 = vmatpush.bf16.msrb.mxu2 %v2225_v1 }
 0x465   :  { %1983 = vmatmul.msk.bf16.vlgmr.msra.gmra.mxu2 %vm639_vm14, %v3018_v42 }
 0x466   :  { %1178 = vmatpush.bf16.msra.mxu2 %v2228_v3 }
 0x46a   :  { %1179 = vmatpush.bf16.msra.mxu2 %v2227_v18 }
 0x4c8   :  { %v3067_v33 = vpop.f32.mrf.mxu2 }
 0x4d0   :  { %v694_v34 = vpop.f32.mrf.mxu3  ;;  %v775_v35 = vpop.f32.mrf.mxu2 }
 0x4d1   :  { %v698_v36 = vpack.c.bf16 %v694_v34, %v694_v34 }
 0x4d3   :  { %1960 = vmatmul.msk.bf16.vlgmr.msrb.gmra.mxu3 %vm639_vm14, %v698_v36 }
 0x4d8   :  { %v696_v48 = vpop.f32.mrf.mxu3  ;;  %v3070_v37 = vpop.f32.mrf.mxu2 }
 0x4e0   :  { %v889_v29 = vpop.f32.mrf.mxu2 }
 0x4e3   :  { %1972 = vmatmul.msk.bf16.vlgmr.msra.gmra.mxu3 %vm639_vm14, %v893_v38 }
 0x4e8   :  { %v987_v39 = vpop.f32.mrf.mxu2 }
 0x4e9   :  { %v991_v6 = vsel %vm2990_vm15, %v987_v39, -1e+30 }
 0x4ea   :  { %v992_v40 = vsel %vm660_vm0, %v991_v6, -inf }
 0x4eb   :  { %993 = vmax.xlane.f32.xlu1 %v992_v40 }
 0x4f0   :  { %v989_v41 = vpop.f32.mrf.mxu2 }
 0x504   :  { %1007 = vrot.lane.b32.xlu1 %v3078_v45, %s2499_s15 }
 0x50c   :  { %1113 = vrot.lane.b32.xlu1 %v3021_v4, %s2502_s29 }
 0x514   :  { %1111 = vrot.lane.b32.xlu1 %v1030_v0, %s2499_s15 }
 0x556   :  { %v3092_v61 = vpop.f32.mrf.mxu3 }
 0x557   :  { %v802_v40 = vadd.f32 %v3092_v61, %v3067_v33 }
 0x559   :  { %v891_v41 = vadd.f32 %v3070_v37, %v802_v40 }
 0x55e   :  { %v803_v42 = vpop.f32.mrf.mxu3  ;;  %v994_v4 = vpop.xlane.xlu1 %993 }
 0x55f   :  { %v995_v49 = vsub.f32 %v991_v6, %v994_v4 }
 0x561   :  { %v996_v50 = vmul.f32 1.442695, %v995_v49 }
 0x563   :  { %2321 = vpow2.f32 %v996_v50 }
 0x566   :  { %v906_v51 = vpop.f32.mrf.mxu3 }
 0x567   :  { %v910_v52 = vsel %vm2990_vm15, %v906_v51, -1e+30 }
 0x568   :  { %v911_v53 = vsel %vm660_vm0, %v910_v52, -inf }
 0x569   :  { %v2322_v54 = vpop.eup %2321  ;;  %912 = vmax.xlane.f32.xlu0 %v911_v53 }
 0x56a   :  { %v998_v55 = vsel %vm660_vm0, %v2322_v54, 0.0 }
 0x56b   :  { %999 = vadd.xlane.f32.xlu2 %v998_v55 }
 0x56e   :  { %v908_v58 = vpop.f32.mrf.mxu3 }
 0x576   :  { %v1008_v59 = vpop.permute.xlu1 %1007 }
 0x577   :  { %v1013_v62 = vsel %vm681_vm7, %v1008_v59, 0  ;;  %v2361_v59 = vld [vmem:[#allocation2] sm:$0xff] }
 0x578   :  { %1022 = vmatpush.bf16.msrb.mxu3 %v1013_v62  ;;  %1072 = vmatpush.bf16.msra.mxu1 %v1013_v62 }
 0x57c   :  { %1104 = vmatpush.bf16.msra.mxu3 %v3052_v19 }
 0x57e   :  { %v1114_v9 = vpop.permute.xlu1 %1113 }
 0x57f   :  { %v1119_v57 = vsel %vm639_vm14, %v1114_v9, 0 }
 0x580   :  { %1105 = vmatpush.bf16.msra.mxu3 %v3058_v20 }
 0x586   :  { %v1112_v21 = vpop.permute.xlu1 %1111 }
 0x5dc   :  { %v913_v63 = vpop.xlane.xlu0 %912 }
 0x5dd   :  { %v914_v2 = vsub.f32 %v910_v52, %v913_v63 }
 0x5de   :  { %v1000_v1 = vpop.xlane.xlu2 %999 }
 0x5df   :  { %v915_v3 = vmul.f32 1.442695, %v914_v2  ;;  %2323 = vrcp.f32 %v1000_v1 }
 0x5e1   :  { %2325 = vpow2.f32 %v915_v3 }
 0x5e5   :  { %v2324_v5 = vpop.eup %2323 }
 0x5e6   :  { %v1002_v7 = vmul.f32 %v2324_v5, %v2322_v54 }
 0x5e7   :  { %v2326_v8 = vpop.eup %2325 }
 0x5e8   :  { %v1003_v10 = vpack.c.bf16 %v1002_v7, %v1002_v7  ;;  %v917_v11 = vsel %vm660_vm0, %v2326_v8, 0.0 }
 0x5e9   :  { %918 = vadd.xlane.f32.xlu0 %v917_v11 }
 0x5ea   :  { %1984 = vmatmul.msk.bf16.vlgmr.msrb.gmra.mxu3 %vm660_vm0, %v1003_v10 }
 0x5eb   :  { %1198 = vmatpush.bf16.xpose.msrb.mxu3 %v1119_v57 }
 0x5fd   :  { %1031 = vrot.lane.b32.xlu0 %v1030_v0, %s2502_s29  ;;  %s1792_s29 = sshll.u32 %s3213_s10, 4  ;;  %s1793_s29 = int_to_ptr.hbm [resolvable:$true] %s1792_s29 }
 0x605   :  { %1186 = vrot.lane.b32.xlu0 %v1030_v0, %s2503_s0 }
 0x65c   :  { %v919_v12 = vpop.xlane.xlu0 %918 }
 0x65d   :  { %2327 = vrcp.f32 %v919_v12 }
 0x663   :  { %v2328_v13 = vpop.eup %2327 }
 0x664   :  { %v921_v14 = vmul.f32 %v2328_v13, %v2326_v8 }
 0x666   :  { %v922_v15 = vpack.c.bf16 %v921_v14, %v921_v14 }
 0x668   :  { %1973 = vmatmul.msk.bf16.vlgmr.msra.gmra.mxu0 %vm660_vm0, %v922_v15 }
 0x669   :  { %1128 = vmatpush.bf16.xpose.msra.mxu0 %v1119_v57 }
 0x66d   :  { %v1024_v16 = vpop.f32.mrf.mxu3 }
 0x66e   :  { %v1028_v17 = vpack.c.bf16 %v1024_v16, %v1024_v16 }
 0x66f   :  { %v1032_v18 = vpop.permute.xlu0 %1031 }
 0x670   :  { %1988 = vmatmul.msk.bf16.vlgmr.msra.gmra.mxu3 %vm639_vm14, %v1028_v17 }
 0x675   :  { %v1026_v19 = vpop.f32.mrf.mxu3 }
 0x677   :  { %v1187_v20 = vpop.permute.xlu0 %1186 }
 0x678   :  { %1985 = vmatmul.msk.bf16.vlgmr.msrb.gmra.mxu0 %vm639_vm14, %v1032_v18 }
 0x680   :  { %1992 = vmatmul.msk.bf16.vlgmr.msrb.gmra.mxu3 %vm639_vm14, %v1187_v20 }
 0x688   :  { %1989 = vmatmul.msk.bf16.vlgmr.msra.gmra.mxu0 %vm639_vm14, %v1112_v21 }
 0x6e5   :  { %v935_v22 = vpop.f32.mrf.mxu0 }
 0x6e6   :  { %v939_v23 = vpack.c.bf16 %v935_v22, %v935_v22 }
 0x6e8   :  { %1982 = vmatmul.msk.bf16.vlgmr.msrb.gmra.mxu1 %vm639_vm14, %v939_v23  ;;  %v2109_v23 = vld [vmem:[#allocation7 + $0xe0] sm:$0xf] }
 0x6ed   :  { %v937_v24 = vpop.f32.mrf.mxu0 }
 0x6ee   :  { %v2261_v24 = vld [vmem:[#allocation7 + $0xec] sm:$0xf0] }
 0x6f3   :  { %v3118_v25 = vpop.f32.mrf.mxu3 }
 0x6f5   :  { %v1045_v26 = vpop.f32.mrf.mxu0 }
 0x6f6   :  { %v1049_v27 = vsel %vm2990_vm15, %v1045_v26, -1e+30  ;;  %v2259_v26 = vld [vmem:[#allocation7 + $0xe4] sm:$0xf] }
 0x6f7   :  { %v1050_v28 = vsel %vm660_vm0, %v1049_v27, -inf }
 0x6f8   :  { %1051 = vmax.xlane.f32.xlu2 %v1050_v28  ;;  %v2117_v28 = vld [vmem:[#allocation7 + $0xe8] sm:$0xf] }
 0x6fb   :  { %v1109_v30 = vpop.f32.mrf.mxu3 }
 0x6fc   :  { %v2262_v30 = vld [vmem:[#allocation7 + $0xf4] sm:$0xf0] }
 0x6fd   :  { %v1047_v31 = vpop.f32.mrf.mxu0 }
 0x703   :  { %v1200_v34 = vpop.f32.mrf.mxu3 }
 0x704   :  { %v1204_v35 = vsel %vm2990_vm15, %v1200_v34, -1e+30  ;;  %v2118_v34 = vor.u32 %v2262_v30, %v2117_v28  ;;  %v2053_v28 = vld [vmem:[#allocation7 + $0x68] sm:$0xf]  ;;  %v2246_v30 = vld [vmem:[#allocation7 + $0x74] sm:$0xf0] }
 0x705   :  { %v1130_v36 = vpop.f32.mrf.mxu0  ;;  %v1205_v48 = vsel %vm660_vm0, %v1204_v35, -inf }
 0x706   :  { %v1134_v29 = vsel %vm2990_vm15, %v1130_v36, -1e+30  ;;  %1206 = vmax.xlane.f32.xlu0 %v1205_v48  ;;  %v2119_v36 = vld [vmem:[#allocation7 + $0xf8] sm:$0xf0] }
 0x707   :  { %v1135_v38 = vsel %vm660_vm0, %v1134_v29, -inf }
 0x708   :  { %1136 = vmax.xlane.f32.xlu1 %v1135_v38 }
 0x70b   :  { %v1202_v39 = vpop.f32.mrf.mxu3 }
 0x70d   :  { %v1132_v6 = vpop.f32.mrf.mxu0 }
 0x765   :  { %v964_v43 = vpop.f32.mrf.mxu1 }
 0x766   :  { %v968_v44 = vadd.f32 %v964_v43, %v891_v41 }
 0x768   :  { %v3137_v62 = vadd.f32 %v2361_v59, %v968_v44  ;;  %v2253_v59 = vld [vmem:[#allocation7 + $0xac] sm:$0xf0] }
 0x76a   :  { %v1254_v63 = vmul.f32 %v3137_v62, %v3137_v62 }
 0x76b   :  { %v1052_v46 = vpop.xlane.xlu2 %1051 }
 0x76c   :  { %v1053_v0 = vsub.f32 %v1049_v27, %v1052_v46  ;;  %v2110_v27 = vor.u32 %v2261_v24, %v2109_v23  ;;  %v2362_v46 = vld [vmem:[#allocation2 + $0x8] sm:$0xff]  ;;  %v2045_v23 = vld [vmem:[#allocation7 + $0x60] sm:$0xf]  ;;  %v2245_v24 = vld [vmem:[#allocation7 + $0x6c] sm:$0xf0] }
 0x76d   :  { %v966_v42 = vpop.f32.mrf.mxu1 }
 0x76e   :  { %v1054_v4 = vmul.f32 1.442695, %v1053_v0 }
 0x770   :  { %2329 = vpow2.f32 %v1054_v4 }
 0x776   :  { %v2330_v56 = vpop.eup %2329 }
 0x777   :  { %v1056_v49 = vsel %vm660_vm0, %v2330_v56, 0.0 }
 0x778   :  { %1057 = vadd.xlane.f32.xlu2 %v1056_v49  ;;  %v2257_v49 = vld [vmem:[#allocation7 + $0xcc] sm:$0xf0] }
 0x779   :  { %v1207_v50 = vpop.xlane.xlu0 %1206 }
 0x77a   :  { %v1208_v51 = vsub.f32 %v1204_v35, %v1207_v50  ;;  %v2260_v35 = vld [vmem:[#allocation7 + $0xec] sm:$0xf]  ;;  %v2255_v50 = vld [vmem:[#allocation7 + $0xc4] sm:$0xf] }
 0x77b   :  { %v1137_v52 = vpop.xlane.xlu1 %1136  ;;  %v2122_v48 = vor.u32 %v2260_v35, %v2119_v36  ;;  %v2244_v35 = vld [vmem:[#allocation7 + $0x6c] sm:$0xf]  ;;  %v2055_v36 = vld [vmem:[#allocation7 + $0x78] sm:$0xf0] }
 0x77c   :  { %v1209_v53 = vmul.f32 1.442695, %v1208_v51  ;;  %v1138_v54 = vsub.f32 %v1134_v29, %v1137_v52  ;;  %v2095_v52 = vld [vmem:[#allocation7 + $0xd0] sm:$0xf0] }
 0x77e   :  { %2331 = vpow2.f32 %v1209_v53  ;;  %v1139_v33 = vmul.f32 1.442695, %v1138_v54  ;;  %v2101_v53 = vld [vmem:[#allocation7 + $0xc8] sm:$0xf]  ;;  %v2258_v54 = vld [vmem:[#allocation7 + $0xd4] sm:$0xf0] }
 0x780   :  { %2333 = vpow2.f32 %v1139_v33  ;;  %v2102_v33 = vor.u32 %v2258_v54, %v2101_v53  ;;  %v2015_v54 = vld [vmem:[#allocation7 + $0x30] sm:$0xf0] }
 0x784   :  { %v2332_v37 = vpop.eup %2331 }
 0x785   :  { %v1211_v61 = vsel %vm660_vm0, %v2332_v37, 0.0 }
 0x786   :  { %v2334_v55 = vpop.eup %2333  ;;  %1212 = vadd.xlane.f32.xlu1 %v1211_v61  ;;  %v2103_v61 = vld [vmem:[#allocation7 + $0xd8] sm:$0xf0] }
 0x787   :  { %v1141_v58 = vsel %vm660_vm0, %v2334_v55, 0.0 }
 0x788   :  { %1142 = vadd.xlane.f32.xlu2 %v1141_v58  ;;  %v2077_v58 = vld [vmem:[#allocation7 + $0xa0] sm:$0xf] }
 0x7a0   :  { %1147 = vrot.lane.b32.xlu2 %v3078_v45, %s2503_s0 }
 0x7c9   :  { %1256 = vadd.xlane.f32.xlu2 %v1254_v63  ;;  %v2251_v63 = vld [vmem:[#allocation7 + $0xa4] sm:$0xf] }
 0x7eb   :  { %v1058_v2 = vpop.xlane.xlu2 %1057 }
 0x7ec   :  { %2335 = vrcp.f32 %v1058_v2  ;;  %v2078_v2 = vor.u32 %v2253_v59, %v2077_v58  ;;  %v2023_v58 = vld [vmem:[#allocation7 + $0x38] sm:$0xf0] }
 0x7f2   :  { %v2336_v1 = vpop.eup %2335 }
 0x7f3   :  { %v1060_v3 = vmul.f32 %v2336_v1, %v2330_v56  ;;  %v2093_v56 = vld [vmem:[#allocation7 + $0xc0] sm:$0xf]  ;;  %v2079_v1 = vld [vmem:[#allocation7 + $0xb0] sm:$0xf0] }
 0x7f4   :  { %v2094_v51 = vor.u32 %v2257_v49, %v2093_v56  ;;  %v2039_v56 = vld [vmem:[#allocation7 + $0x58] sm:$0xf0] }
 0x7f5   :  { %v1061_v5 = vpack.c.bf16 %v1060_v3, %v1060_v3  ;;  %v2085_v3 = vld [vmem:[#allocation7 + $0xa8] sm:$0xf] }
 0x7f7   :  { %1986 = vmatmul.msk.bf16.vlgmr.msra.gmra.mxu1 %vm660_vm0, %v1061_v5  ;;  %v2254_v5 = vld [vmem:[#allocation7 + $0xb4] sm:$0xf0] }
 0x7f9   :  { %v1213_v7 = vpop.xlane.xlu1 %1212 }
 0x7fa   :  { %2337 = vrcp.f32 %v1213_v7  ;;  %v2082_v7 = vor.u32 %v2251_v63, %v2079_v1  ;;  %v1997_v63 = vld [vmem:[#allocation7] sm:$0xf]  ;;  %v2231_v1 = vld [vmem:[#allocation7 + $0x4] sm:$0xf] }
 0x7fb   :  { %v1143_v8 = vpop.xlane.xlu2 %1142 }
 0x7fc   :  { %2339 = vrcp.f32 %v1143_v8  ;;  %v2086_v8 = vor.u32 %v2254_v5, %v2085_v3  ;;  %v1999_v5 = vld [vmem:[#allocation7 + $0x10] sm:$0xf0] }
 0x800   :  { %v2338_v9 = vpop.eup %2337 }
 0x801   :  { %v1215_v10 = vmul.f32 %v2338_v9, %v2332_v37  ;;  %v2256_v37 = vld [vmem:[#allocation7 + $0xcc] sm:$0xf] }
 0x802   :  { %v2340_v45 = vpop.eup %2339  ;;  %v2252_v9 = vld [vmem:[#allocation7 + $0xac] sm:$0xf] }
 0x803   :  { %v1145_v11 = vmul.f32 %v2340_v45, %v2334_v55  ;;  %v1148_v57 = vpop.permute.xlu2 %1147  ;;  %v1216_v14 = vpack.c.bf16 %v1215_v10, %v1215_v10  ;;  %v2106_v55 = vor.u32 %v2256_v37, %v2103_v61  ;;  %v2087_v45 = vld [vmem:[#allocation7 + $0xb8] sm:$0xf0] }
 0x804   :  { %v1153_v12 = vsel %vm681_vm7, %v1148_v57, 0  ;;  %v2090_v10 = vor.u32 %v2252_v9, %v2087_v45  ;;  %v2061_v57 = vld [vmem:[#allocation7 + $0x80] sm:$0xf]  ;;  %v2002_v9 = vor.u32 %v2231_v1, %v1999_v5 }
 0x805   :  { %v1146_v13 = vpack.c.bf16 %v1145_v11, %v1145_v11  ;;  %1162 = vmatpush.bf16.msrb.mxu1 %v1153_v12  ;;  %1227 = vmatpush.bf16.msrb.mxu0 %v1153_v12  ;;  %v2249_v12 = vld [vmem:[#allocation7 + $0x8c] sm:$0xf0] }
 0x808   :  { %1990 = vmatmul.msk.bf16.vlgmr.msrb.gmra.mxu1 %vm660_vm0, %v1146_v13  ;;  %1993 = vmatmul.msk.bf16.vlgmr.msrb.gmra.mxu0 %vm660_vm0, %v1216_v14  ;;  %v2247_v13 = vld [vmem:[#allocation7 + $0x84] sm:$0xf]  ;;  %v2062_v14 = vor.u32 %v2249_v12, %v2061_v57 }
 0x809   :  { %1243 = vmatpush.bf16.msra.mxu1 %v3089_v60  ;;  %1512 = vmatpush.bf16.msra.mxu0 %v2118_v34  ;;  %v2054_v34 = vor.u32 %v2246_v30, %v2053_v28 }
 0x80d   :  { %1244 = vmatpush.bf16.msra.mxu1 %v3097_v47  ;;  %v2111_v47 = vld [vmem:[#allocation7 + $0xf0] sm:$0xf0]  ;;  %1513 = vmatpush.bf16.msra.mxu0 %v2102_v33  ;;  %v2238_v33 = vld [vmem:[#allocation7 + $0x34] sm:$0xf0] }
 0x80e   :  { %v2114_v31 = vor.u32 %v2259_v26, %v2111_v47  ;;  %v2243_v26 = vld [vmem:[#allocation7 + $0x64] sm:$0xf]  ;;  %v2047_v47 = vld [vmem:[#allocation7 + $0x70] sm:$0xf0] }
 0x810   :  { %1498 = vmatpush.bf16.msra.mxu3 %v2114_v31  ;;  %v2050_v31 = vor.u32 %v2243_v26, %v2047_v47  ;;  %v2294_v47 = vld [vmem:[%s3210_s7] ss:$0 sm:$0xff]  ;;  %s2504_s7 = smov [#allocation10]  }
 0x811   :  { %1526 = vmatpush.bf16.msrb.mxu1 %v2122_v48  ;;  %1514 = vmatpush.bf16.msra.mxu0 %v2086_v8  ;;  %v2234_v8 = vld [vmem:[#allocation7 + $0x14] sm:$0xf0]  ;;  %s1790_s5 = sshll.u32 %s2504_s7, 4  ;;  %s1791_s5 = int_to_ptr.vmem [resolvable:$true] %s1790_s5 }
 0x815   :  { %1527 = vmatpush.bf16.msrb.mxu1 %v2106_v55  ;;  %v2236_v55 = vld [vmem:[#allocation7 + $0x2c] sm:$0xf] }
 0x816   :  { %v2026_v59 = vor.u32 %v2236_v55, %v2023_v58  ;;  %v2263_v58 = vld [vmem:[#allocation8] sm:$0xff] }
 0x819   :  { %1528 = vmatpush.bf16.msrb.mxu1 %v2090_v10  ;;  %v2232_v10 = vld [vmem:[#allocation7 + $0xc] sm:$0xf] }
 0x83c   :  { %v1257_v11 = vpop.xlane.xlu2 %1256 }
 0x874   :  { %v1074_v15 = vpop.f32.mrf.mxu1 }
 0x875   :  { %v1078_v16 = vpack.c.bf16 %v1074_v15, %v1074_v15  ;;  %v2063_v15 = vld [vmem:[#allocation7 + $0x90] sm:$0xf0] }
 0x877   :  { %1987 = vmatmul.msk.bf16.vlgmr.msrb.gmra.mxu2 %vm639_vm14, %v1078_v16  ;;  %v2069_v16 = vld [vmem:[#allocation7 + $0x88] sm:$0xf] }
 0x878   :  { %1484 = vmatpush.bf16.msrb.mxu2 %v2110_v27  ;;  %v2046_v27 = vor.u32 %v2245_v24, %v2045_v23 }
 0x87c   :  { %v1076_v17 = vpop.f32.mrf.mxu1  ;;  %1485 = vmatpush.bf16.msrb.mxu2 %v2094_v51  ;;  %v2237_v51 = vld [vmem:[#allocation7 + $0x2c] sm:$0xf0] }
 0x87d   :  { %v2250_v17 = vld [vmem:[#allocation7 + $0x94] sm:$0xf0] }
 0x880   :  { %1486 = vmatpush.bf16.msrb.mxu2 %v2078_v2  ;;  %v2233_v2 = vld [vmem:[#allocation7 + $0xc] sm:$0xf0] }
 0x881   :  { %v1998_v3 = vor.u32 %v2233_v2, %v1997_v63 }
 0x884   :  { %1487 = vmatpush.bf16.msrb.mxu2 %v2062_v14 }
 0x885   :  { %v1164_v18 = vpop.f32.mrf.mxu1  ;;  %v1229_v19 = vpop.f32.mrf.mxu0 }
 0x886   :  { %v1168_v20 = vpack.c.bf16 %v1164_v18, %v1164_v18  ;;  %v1233_v21 = vpack.c.bf16 %v1229_v19, %v1229_v19  ;;  %v2066_v18 = vor.u32 %v2247_v13, %v2063_v15  ;;  %v2070_v19 = vor.u32 %v2250_v17, %v2069_v16 }
 0x888   :  { %1991 = vmatmul.msk.bf16.vlgmr.msra.gmra.mxu2 %vm639_vm14, %v1168_v20  ;;  %1994 = vmatmul.msk.bf16.vlgmr.msra.gmra.mxu1 %vm639_vm14, %v1233_v21  ;;  %v2248_v20 = vld [vmem:[#allocation7 + $0x8c] sm:$0xf]  ;;  %v2071_v21 = vld [vmem:[#allocation7 + $0x98] sm:$0xf0] }
 0x889   :  { %1515 = vmatpush.bf16.msra.mxu0 %v2070_v19  ;;  %1488 = vmatpush.bf16.msrb.mxu2 %v2046_v27 }
 0x88d   :  { %v1166_v60 = vpop.f32.mrf.mxu1  ;;  %v1231_v22 = vpop.f32.mrf.mxu0  ;;  %1516 = vmatpush.bf16.msra.mxu0 %v2054_v34 }
 0x88e   :  { %v1260_v60 = vmul.f32 %v1257_v11, %v2760_v32  ;;  %v2074_v22 = vor.u32 %v2248_v20, %v2071_v21  ;;  %v2007_v11 = vld [vmem:[#allocation7 + $0x18] sm:$0xf0] }
 0x88f   :  { %v2010_v57 = vor.u32 %v2232_v10, %v2007_v11 }
 0x890   :  { %1529 = vmatpush.bf16.msrb.mxu1 %v2074_v22  ;;  %v3156_v48 = vadd.f32 1e-06, %v1260_v60 }
 0x892   :  { %2341 = vrsqrt.f32 %v3156_v48  ;;  %vm1270_vm9 = vweird.f32 %v3156_v48 }
 0x898   :  { %v2342_v12 = vpop.eup %2341 }
 0x899   :  { %v1265_v13 = vmul.f32 %v2342_v12, %v3156_v48  ;;  %vm1271_vm8 = vweird.f32 %v2342_v12  ;;  %v2278_v48 = vld [vmem:[#allocation8 + $0x78] sm:$0xff] }
 0x89a   :  { %vm1272_vm10 = vmor %vm1270_vm9, %vm1271_vm8 }
 0x89b   :  { %v1266_v16 = vmul.f32 %v2342_v12, %v1265_v13 }
 0x8fa   :  { %v1091_v29 = vpop.f32.mrf.mxu2 }
 0x8fb   :  { %v1108_v6 = vadd.f32 %v3118_v25, %v1091_v29  ;;  %v2098_v25 = vor.u32 %v2255_v50, %v2095_v52  ;;  %v2058_v29 = vor.u32 %v2244_v35, %v2055_v36  ;;  %v2013_v50 = vld [vmem:[#allocation7 + $0x20] sm:$0xf]  ;;  %v2235_v52 = vld [vmem:[#allocation7 + $0x24] sm:$0xf]  ;;  %v2270_v36 = vld [vmem:[#allocation8 + $0x38] sm:$0xff] }
 0x8fc   :  { %v2014_v53 = vor.u32 %v2237_v51, %v2013_v50  ;;  %v2018_v37 = vor.u32 %v2235_v52, %v2015_v54  ;;  %v2273_v50 = vld [vmem:[#allocation8 + $0x50] sm:$0xff]  ;;  %v2264_v51 = vld [vmem:[#allocation8 + $0x8] sm:$0xff] }
 0x8fd   :  { %1499 = vmatpush.bf16.msra.mxu3 %v2098_v25  ;;  %1530 = vmatpush.bf16.msrb.mxu1 %v2058_v29  ;;  %v2021_v25 = vld [vmem:[#allocation7 + $0x28] sm:$0xf]  ;;  %v2269_v29 = vld [vmem:[#allocation8 + $0x30] sm:$0xff] }
 0x8fe   :  { %v2022_v61 = vor.u32 %v2238_v33, %v2021_v25  ;;  %v2272_v52 = vld [vmem:[#allocation8 + $0x48] sm:$0xff] }
 0x901   :  { %1500 = vmatpush.bf16.msra.mxu3 %v2082_v7  ;;  %v2005_v7 = vld [vmem:[#allocation7 + $0x8] sm:$0xf] }
 0x902   :  { %v1093_v38 = vpop.f32.mrf.mxu2  ;;  %v2006_v45 = vor.u32 %v2234_v8, %v2005_v7 }
 0x903   :  { %v2029_v38 = vld [vmem:[#allocation7 + $0x40] sm:$0xf] }
 0x905   :  { %v1246_v39 = vpop.f32.mrf.mxu1  ;;  %1501 = vmatpush.bf16.msra.mxu3 %v2066_v18  ;;  %v1267_v18 = vmul.f32 0.5, %v1266_v16 }
 0x907   :  { %v1268_v19 = vsub.f32 1.5, %v1267_v18 }
 0x909   :  { %1502 = vmatpush.bf16.msra.mxu3 %v2050_v31  ;;  %v1269_v60 = vmul.f32 %v2342_v12, %v1268_v19 }
 0x90b   :  { %v1181_v40 = vpop.f32.mrf.mxu2  ;;  %v1273_v24 = vsel %vm1272_vm10, %v2342_v12, %v1269_v60 }
 0x90c   :  { %v1185_v41 = vadd.f32 %v1181_v40, %v1108_v6  ;;  %v2239_v6 = vld [vmem:[#allocation7 + $0x44] sm:$0xf] }
 0x90d   :  { %v1248_v43 = vpop.f32.mrf.mxu1 }
 0x90e   :  { %v1250_v44 = vadd.f32 %v1246_v39, %v1185_v41  ;;  %v2241_v39 = vld [vmem:[#allocation7 + $0x4c] sm:$0xf0]  ;;  %v2031_v41 = vld [vmem:[#allocation7 + $0x50] sm:$0xf0]  ;;  %v2037_v43 = vld [vmem:[#allocation7 + $0x48] sm:$0xf] }
 0x90f   :  { %v2030_v40 = vor.u32 %v2241_v39, %v2029_v38  ;;  %v2277_v38 = vld [vmem:[#allocation8 + $0x70] sm:$0xff]  ;;  %v2268_v39 = vld [vmem:[#allocation8 + $0x28] sm:$0xff] }
 0x910   :  { %v3151_v0 = vadd.f32 %v2362_v46, %v1250_v44  ;;  %v2242_v44 = vld [vmem:[#allocation7 + $0x54] sm:$0xf0]  ;;  %v2034_v46 = vor.u32 %v2239_v6, %v2031_v41  ;;  %v2276_v6 = vld [vmem:[#allocation8 + $0x68] sm:$0xff]  ;;  %v2275_v41 = vld [vmem:[#allocation8 + $0x60] sm:$0xff] }
 0x911   :  { %1489 = vmatpush.bf16.msrb.mxu2 %v2030_v40  ;;  %v2267_v40 = vld [vmem:[#allocation8 + $0x20] sm:$0xff] }
 0x912   :  { %v1255_v42 = vmul.f32 %v3151_v0, %v3151_v0  ;;  %1503 = vmatpush.bf16.msra.mxu3 %v2034_v46 }
 0x913   :  { %v1183_v4 = vpop.f32.mrf.mxu2 }
 0x914   :  { %1258 = vadd.xlane.f32.xlu0 %v1255_v42  ;;  %v2038_v42 = vor.u32 %v2242_v44, %v2037_v43  ;;  %v2240_v4 = vld [vmem:[#allocation7 + $0x4c] sm:$0xf]  ;;  %v2266_v43 = vld [vmem:[#allocation8 + $0x18] sm:$0xff] }
 0x915   :  { %v2042_v49 = vor.u32 %v2240_v4, %v2039_v56  ;;  %1490 = vmatpush.bf16.msrb.mxu2 %v2014_v53  ;;  %v2274_v44 = vld [vmem:[#allocation8 + $0x58] sm:$0xff] }
 0x916   :  { %1517 = vmatpush.bf16.msra.mxu0 %v2038_v42  ;;  %1504 = vmatpush.bf16.msra.mxu3 %v2018_v37 }
 0x917   :  { %1531 = vmatpush.bf16.msrb.mxu1 %v2042_v49  ;;  %v2265_v49 = vld [vmem:[#allocation8 + $0x10] sm:$0xff] }
 0x919   :  { %1491 = vmatpush.bf16.msrb.mxu2 %v1998_v3 }
 0x91a   :  { %1518 = vmatpush.bf16.msra.mxu0 %v2022_v61  ;;  %1505 = vmatpush.bf16.msra.mxu3 %v2002_v9 }
 0x91b   :  { %1532 = vmatpush.bf16.msrb.mxu1 %v2026_v59  ;;  %v2271_v59 = vld [vmem:[#allocation8 + $0x40] sm:$0xff] }
 0x91d   :  { %1754 = vmatpush.bf16.msra.mxu2 %v2270_v36 }
 0x91e   :  { %1519 = vmatpush.bf16.msra.mxu0 %v2006_v45  ;;  %1768 = vmatpush.bf16.msrb.mxu3 %v2278_v48 }
 0x91f   :  { %1533 = vmatpush.bf16.msrb.mxu1 %v2010_v57 }
 0x921   :  { %1755 = vmatpush.bf16.msra.mxu2 %v2269_v29 }
 0x922   :  { %1769 = vmatpush.bf16.msrb.mxu3 %v2277_v38 }
 0x925   :  { %1756 = vmatpush.bf16.msra.mxu2 %v2268_v39 }
 0x926   :  { %1770 = vmatpush.bf16.msrb.mxu3 %v2276_v6 }
 0x929   :  { %1757 = vmatpush.bf16.msra.mxu2 %v2267_v40 }
 0x92a   :  { %1771 = vmatpush.bf16.msrb.mxu3 %v2275_v41 }
 0x92d   :  { %1758 = vmatpush.bf16.msra.mxu2 %v2266_v43 }
 0x92e   :  { %1772 = vmatpush.bf16.msrb.mxu3 %v2274_v44 }
 0x931   :  { %1759 = vmatpush.bf16.msra.mxu2 %v2265_v49 }
 0x932   :  { %1773 = vmatpush.bf16.msrb.mxu3 %v2273_v50 }
 0x935   :  { %1760 = vmatpush.bf16.msra.mxu2 %v2264_v51 }
 0x936   :  { %1774 = vmatpush.bf16.msrb.mxu3 %v2272_v52 }
 0x939   :  { %1761 = vmatpush.bf16.msra.mxu2 %v2263_v58 }
 0x93a   :  { %1775 = vmatpush.bf16.msrb.mxu3 %v2271_v59 }
 0x987   :  { %v1259_v14 = vpop.xlane.xlu0 %1258 }
 0x988   :  { %v1261_v15 = vmul.f32 %v1259_v14, %v2760_v32  ;;  %v1284_v32 = vmul.f32 %v1273_v24, %v3137_v62 }
 0x98a   :  { %v1263_v17 = vadd.f32 1e-06, %v1261_v15  ;;  %v1289_v31 = vmul.f32 %v2294_v47, %v1284_v32 }
 0x98c   :  { %2343 = vrsqrt.f32 %v1263_v17  ;;  %vm1280_vm12 = vweird.f32 %v1263_v17 }
 0x992   :  { %v2344_v20 = vpop.eup %2343 }
 0x993   :  { %v1275_v21 = vmul.f32 %v2344_v20, %v1263_v17  ;;  %vm1281_vm11 = vweird.f32 %v2344_v20 }
 0x994   :  { %vm1282_vm13 = vmor %vm1280_vm12, %vm1281_vm11 }
 0x995   :  { %v1276_v22 = vmul.f32 %v2344_v20, %v1275_v21 }
 0x997   :  { %v1277_v23 = vmul.f32 0.5, %v1276_v22 }
 0x999   :  { %v1278_v26 = vsub.f32 1.5, %v1277_v23 }
 0x99b   :  { %v1279_v27 = vmul.f32 %v2344_v20, %v1278_v26 }
 0x99d   :  { %v1283_v28 = vsel %vm1282_vm13, %v2344_v20, %v1279_v27 }
 0x99e   :  { %v1285_v30 = vmul.f32 %v1283_v28, %v3151_v0 }
 0x9a0   :  { %v1290_v34 = vmul.f32 %v2294_v47, %v1285_v30 }
 0x9a2   :  { %v1291_v35 = vpack.c.bf16 %v1290_v34, %v1289_v31 }
 0x9a4   :  { %1492 = vmatmul.bf16.vlgmr.msrb.gmra.mxu2 %v1291_v35  ;;  %1506 = vmatmul.bf16.vlgmr.msra.gmra.mxu3 %v1291_v35 }
 0x9a5   :  { %1520 = vmatmul.bf16.vlgmr.msra.gmra.mxu0 %v1291_v35  ;;  %1534 = vmatmul.bf16.vlgmr.msrb.gmra.mxu1 %v1291_v35 }
 0xa22   :  { %v1521_v18 = vpop.f32.mrf.mxu0  ;;  %v1535_v47 = vpop.f32.mrf.mxu1 }
 0xa27   :  { %v3167_v46 = vpop.f32.mrf.mxu2  ;;  %v3169_v42 = vpop.f32.mrf.mxu3 }
 0xa28   :  { %v2123_v4 = vmul.f32 -1.442695, %v3167_v46  ;;  %v2124_v56 = vmul.f32 -1.442695, %v3169_v42 }
 0xa2a   :  { %2345 = vpow2.f32 %v2123_v4  ;;  %v1523_v52 = vpop.f32.mrf.mxu0 }
 0xa2b   :  { %2347 = vpow2.f32 %v2124_v56 }
 0xa2f   :  { %v3173_v53 = vpop.f32.mrf.mxu2  ;;  %v3175_v54 = vpop.f32.mrf.mxu3 }
 0xa30   :  { %v2346_v25 = vpop.eup %2345  ;;  %v2125_v33 = vmul.f32 -1.442695, %v3173_v53  ;;  %v2126_v55 = vmul.f32 -1.442695, %v3175_v54 }
 0xa31   :  { %v2348_v37 = vpop.eup %2347  ;;  %v1552_v61 = vadd.f32 1.0, %v2346_v25 }
 0xa32   :  { %v1553_v63 = vadd.f32 1.0, %v2348_v37  ;;  %2349 = vpow2.f32 %v2125_v33 }
 0xa33   :  { %2351 = vrcp.f32 %v1552_v61  ;;  %v1567_v15 = vand.u32 2147483648, %v1552_v61  ;;  %vm1561_vm15 = vweird.f32 %v1552_v61  ;;  %v1565_v16 = vand.u32 2147483647, %v1552_v61 }
 0xa34   :  { %2353 = vrcp.f32 %v1553_v63  ;;  %v1580_v21 = vand.u32 2147483647, %v1553_v63  ;;  %v1582_v23 = vand.u32 2147483648, %v1553_v63  ;;  %vm1576_vm2 = vweird.f32 %v1553_v63 }
 0xa35   :  { %2355 = vpow2.f32 %v2126_v55  ;;  %v1568_v26 = vor.u32 1.1754944e-38, %v1567_v15  ;;  %vm1566_vm3 = vcmp.eq.f32.partialorder %v1565_v16, 8.507059e+37  ;;  %v1537_v55 = vpop.f32.mrf.mxu1 }
 0xa36   :  { %vm1581_vm6 = vcmp.eq.f32.partialorder %v1580_v21, 8.507059e+37  ;;  %v1583_v48 = vor.u32 1.1754944e-38, %v1582_v23 }
 0xa38   :  { %v2350_v2 = vpop.eup %2349 }
 0xa39   :  { %v2352_v1 = vpop.eup %2351  ;;  %v1554_v3 = vadd.f32 1.0, %v2350_v2 }
 0xa3a   :  { %v2354_v5 = vpop.eup %2353  ;;  %v1557_v7 = vmul.f32 %v2352_v1, %v1552_v61  ;;  %vm1562_vm14 = vweird.f32 %v2352_v1 }
 0xa3b   :  { %v2356_v8 = vpop.eup %2355  ;;  %v1572_v9 = vmul.f32 %v2354_v5, %v1553_v63  ;;  %2357 = vrcp.f32 %v1554_v3  ;;  %vm3179_vm0 = vmor %vm1561_vm15, %vm1562_vm14  ;;  %vm1577_vm1 = vweird.f32 %v2354_v5  ;;  %v1597_v27 = vand.u32 2147483648, %v1554_v3 }
 0xa3c   :  { %v1558_v45 = vsub.f32 1.0, %v1557_v7  ;;  %v1555_v10 = vadd.f32 1.0, %v2356_v8  ;;  %vm3185_vm4 = vmor %vm1576_vm2, %vm1577_vm1  ;;  %v1595_v31 = vand.u32 2147483647, %v1554_v3  ;;  %vm1591_vm7 = vweird.f32 %v1554_v3 }
 0xa3d   :  { %v1573_v11 = vsub.f32 1.0, %v1572_v9  ;;  %v1598_v39 = vor.u32 1.1754944e-38, %v1597_v27 }
 0xa3e   :  { %v1559_v57 = vmul.f32 %v2352_v1, %v1558_v45  ;;  %2359 = vrcp.f32 %v1555_v10  ;;  %v1612_v38 = vand.u32 2147483648, %v1555_v10  ;;  %v1610_v40 = vand.u32 2147483647, %v1555_v10 }
 0xa3f   :  { %v1574_v12 = vmul.f32 %v2354_v5, %v1573_v11  ;;  %vm1596_vm10 = vcmp.eq.f32.partialorder %v1595_v31, 8.507059e+37  ;;  %vm1606_vm11 = vweird.f32 %v1555_v10 }
 0xa40   :  { %v1560_v13 = vadd.f32 %v2352_v1, %v1559_v57  ;;  %v1613_v50 = vor.u32 1.1754944e-38, %v1612_v38  ;;  %vm1611_vm13 = vcmp.eq.f32.partialorder %v1610_v40, 8.507059e+37 }
 0xa41   :  { %v2358_v14 = vpop.eup %2357  ;;  %v1575_v20 = vadd.f32 %v2354_v5, %v1574_v12 }
 0xa42   :  { %v1587_v17 = vmul.f32 %v2358_v14, %v1554_v3  ;;  %v1564_v22 = vsel %vm3179_vm0, %v2352_v1, %v1560_v13  ;;  %vm1592_vm5 = vweird.f32 %v2358_v14 }
 0xa43   :  { %v1569_v34 = vsel %vm1566_vm3, %v1568_v26, %v1564_v22  ;;  %v1579_v35 = vsel %vm3185_vm4, %v2354_v5, %v1575_v20  ;;  %vm1593_vm8 = vmor %vm1591_vm7, %vm1592_vm5 }
 0xa44   :  { %v2360_v60 = vpop.eup %2359  ;;  %v1588_v24 = vsub.f32 1.0, %v1587_v17  ;;  %v1616_v41 = vmul.f32 %v1569_v34, %v3167_v46  ;;  %v1584_v43 = vsel %vm1581_vm6, %v1583_v48, %v1579_v35 }
 0xa45   :  { %v1602_v32 = vmul.f32 %v2360_v60, %v1555_v10  ;;  %vm1607_vm9 = vweird.f32 %v2360_v60  ;;  %v1617_v51 = vmul.f32 %v1584_v43, %v3169_v42 }
 0xa46   :  { %v1589_v30 = vmul.f32 %v2358_v14, %v1588_v24  ;;  %vm1608_vm12 = vmor %vm1606_vm11, %vm1607_vm9  ;;  %v1620_v33 = vmul.f32 %v1616_v41, %v1521_v18 }
 0xa47   :  { %v1603_v36 = vsub.f32 1.0, %v1602_v32  ;;  %v1621_v59 = vmul.f32 %v1617_v51, %v1535_v47 }
 0xa48   :  { %v1590_v29 = vadd.f32 %v2358_v14, %v1589_v30 }
 0xa49   :  { %v1604_v6 = vmul.f32 %v2360_v60, %v1603_v36 }
 0xa4a   :  { %v1594_v44 = vsel %vm1593_vm8, %v2358_v14, %v1590_v29 }
 0xa4b   :  { %v1599_v4 = vsel %vm1596_vm10, %v1598_v39, %v1594_v44  ;;  %v1605_v56 = vadd.f32 %v2360_v60, %v1604_v6 }
 0xa4c   :  { %v1618_v49 = vmul.f32 %v1599_v4, %v3173_v53 }
 0xa4d   :  { %v1609_v25 = vsel %vm1608_vm12, %v2360_v60, %v1605_v56 }
 0xa4e   :  { %v1622_v37 = vmul.f32 %v1618_v49, %v1523_v52  ;;  %v1614_v61 = vsel %vm1611_vm13, %v1613_v50, %v1609_v25 }
 0xa4f   :  { %v1619_v46 = vmul.f32 %v1614_v61, %v3175_v54 }
 0xa50   :  { %v1624_v58 = vpack.c.bf16 %v1622_v37, %v1620_v33 }
 0xa51   :  { %v1623_v63 = vmul.f32 %v1619_v46, %v1537_v55 }
 0xa52   :  { %1762 = vmatmul.bf16.vlgmr.msra.gmra.mxu2 %v1624_v58 }
 0xa53   :  { %v1625_v2 = vpack.c.bf16 %v1623_v63, %v1621_v59 }
 0xa55   :  { %1776 = vmatmul.bf16.vlgmr.msrb.gmra.mxu3 %v1625_v2 }
 0xad5   :  { %v1763_v53 = vpop.f32.mrf.mxu2 }
 0xad8   :  { %v1777_v1 = vpop.f32.mrf.mxu3 }
 0xad9   :  { %v1778_v3 = vadd.f32 %v1777_v1, %v1763_v53 }
 0xadb   :  { %v1782_v42 = vadd.f32 %v1778_v3, %v3137_v62 }
 0xadd   :  { %1784 = vst [vmem:[#allocation10] sm:$0xff] %v1782_v42  ;;  %v1765_v5 = vpop.f32.mrf.mxu2 }
 0xae0   :  { %v1779_v7 = vpop.f32.mrf.mxu3 }
 0xae1   :  { %v1780_v54 = vadd.f32 %v1779_v7, %v1765_v5 }
 0xae3   :  { %v1783_v8 = vadd.f32 %v1780_v54, %v3151_v0 }
 0xae5   :  { %1785 = vst [vmem:[#allocation10 + $0x8] sm:$0xff] %v1783_v8 }
 0xae6   :  { %1798 = dma.vmem_to_hbm [thread:$0]  %s1791_s5, 256, %s1793_s29, [#allocation4], %s2495_s25, %s2495_s25, %s2496_s26  }
 0xae7   :  { %2489 = dma.done.wait [#allocation4], 256  }
 0xae8   :  { %2490 = vsyncadd [#allocation4], 4294967040 }
 0xae9   :  { %1803 = vsyncpa [#allocation3], 1 }
 0xaea   :  { %1804 = vsyncpa [#allocation6], 1 }
 0xaeb   :  { %1805 = vsyncpa [#allocation9], 1 }
 0xaec   :  { %1806 = vsyncpa [#allocation4], 1 }

</bundles_post_ra>
